<compile_context>
chip_gen: v5e
topology: v5e:2x2
jax: 0.10.0
libtpu: 0.0.40
codegen_flags: <defaults>
</compile_context>

<pallas_src>
import functools

import jax
import jax.numpy as jnp
import numpy as np
from jax.experimental import pallas as pl
from jax.experimental.pallas import tpu as pltpu


def _round_up(x, m):
    return ((x + m - 1) // m) * m


def _decompose_conv_kernel(x_ref, w_ref, m_ref, b_ref, o_ref, *, kh, kw, tr, wout_p):
    """One (batch n, output-row tile r) grid step.

    x_ref : (1, 2, Hin_p, Win_p, Cin)  zero-padded channels-last input (resident per n)
    w_ref : (kh, kw, Cin, Cout)        spatial conv weights
    m_ref : (2*Cout, 2*Cout)           fused time-mix matrix [[W2^T, W1^T], [W3^T, W2^T]]
    b_ref : (1, 2*Cout)                conv bias folded through the mix matrix
    o_ref : (1, TP, 2*Cout)            TP = tr*wout_p output pixels; lanes = [y_t0 | y_t1]
    """
    tp = tr * wout_p
    cin = x_ref.shape[-1]
    r0 = pl.multiple_of(pl.program_id(1) * tr, tr)

    # Direct conv: accumulate kh*kw shifted-window matmuls on the MXU.
    # Both time slices are stacked along M (rows [0,tp) = t0, [tp,2tp) = t1).
    acc = None
    for i in range(kh):
        for j in range(kw):
            win = x_ref[0, :, pl.ds(r0 + i, tr), j:j + wout_p, :]   # (2, tr, wout_p, cin)
            lhs = win.reshape(2 * tp, cin)                          # layout-preserving (wout_p % 8 == 0)
            part = jnp.dot(lhs, w_ref[i, j], preferred_element_type=jnp.float32)
            acc = part if acc is None else acc + part

    # Fused time mixing: [y0 | y1] = [s0 | s1] @ M + (bias folded through M).
    s = jnp.concatenate([acc[:tp], acc[tp:]], axis=-1)              # (tp, 2*Cout)
    y = jnp.dot(s, m_ref[...], preferred_element_type=jnp.float32) + b_ref[...]
    o_ref[0] = y.astype(o_ref.dtype)


def decompose_conv(x, w2d, bias, w1, w2, w3, *, padding=(1, 1), block_rows=None):
    """x: (N, Cin, T=2, H, W) NCDHW; w2d: (Cout, Cin, kh, kw); wX: (Cout, Cout)."""
    N, Cin, T, H, W = x.shape
    assert T == 2, "Decompose_conv forward assumes 2 time slices"
    Cout, Cin_w, kh, kw = w2d.shape
    assert Cin_w == Cin
    ph, pw = padding
    hout = H + 2 * ph - kh + 1
    wout = W + 2 * pw - kw + 1

    # --- tiling: output-pixel tile TP = TR rows x wout_p cols (wout_p % 8 == 0) ---
    wout_p = _round_up(wout, 8)
    if block_rows is None:
        block_rows = max(1, 512 // wout_p)       # aim for ~512-row MXU tiles
    tr = max(1, min(block_rows, hout))
    hout_p = _round_up(hout, tr)
    tp = tr * wout_p

    hin_p = hout_p + kh - 1                      # rows needed by the last tile
    win_p = wout_p + kw - 1                      # cols needed by the widest tap

    # --- glue: channels-last + zero padding only (NO im2col in HBM) ---
    x_nt = jnp.transpose(x, (0, 2, 3, 4, 1))                         # (N, T, H, W, Cin)
    x_pad = jnp.pad(x_nt, ((0, 0), (0, 0),
                           (ph, hin_p - H - ph),
                           (pw, win_p - W - pw),
                           (0, 0)))                                  # (N, 2, hin_p, win_p, Cin)

    w_s = jnp.transpose(w2d, (2, 3, 1, 0))                           # (kh, kw, Cin, Cout)

    # Fused time-mix matrix:  [y0 | y1] = [s0 | s1] @ M
    #   y0 = W2 s0 + W3 s1 ,  y1 = W1 s0 + W2 s1   (1x1x1 convs => right-mult by W^T)
    m_mix = jnp.concatenate(
        [jnp.concatenate([w2.T, w1.T], axis=1),
         jnp.concatenate([w3.T, w2.T], axis=1)], axis=0)             # (2*Cout, 2*Cout)
    # Conv bias is added before the 1x1x1 convs -> fold it through M.
    b_mix = (jnp.concatenate([bias, bias]) @ m_mix).reshape(1, 2 * Cout)

    n_row_tiles = hout_p // tr
    pp = hout_p * wout_p

    # --- VMEM budget (double-buffered blocks + resident weights); cap for v7x ---
    itemsize = jnp.dtype(x.dtype).itemsize
    blk_bytes = (2 * hin_p * win_p * Cin                 # input image block
                 + tp * 2 * Cout                         # output slab
                 + kh * kw * Cin * Cout                  # spatial weights
                 + 4 * Cout * Cout + 2 * Cout) * itemsize
    vmem_limit = int(min(max(4 * blk_bytes + (8 << 20), 32 << 20), 64 << 20))

    kernel = functools.partial(_decompose_conv_kernel,
                               kh=kh, kw=kw, tr=tr, wout_p=wout_p)

    out = pl.pallas_call(
        kernel,
        out_shape=jax.ShapeDtypeStruct((N, pp, 2 * Cout), x.dtype),
        grid_spec=pltpu.PrefetchScalarGridSpec(
            num_scalar_prefetch=0,
            grid=(N, n_row_tiles),
            in_specs=[
                # Whole padded image per batch item; index depends only on n,
                # so it is fetched once per n and reused across row tiles.
                pl.BlockSpec((1, 2, hin_p, win_p, Cin), lambda n, r: (n, 0, 0, 0, 0)),
                pl.BlockSpec((kh, kw, Cin, Cout), lambda n, r: (0, 0, 0, 0)),
                pl.BlockSpec((2 * Cout, 2 * Cout), lambda n, r: (0, 0)),
                pl.BlockSpec((1, 2 * Cout), lambda n, r: (0, 0)),
            ],
            out_specs=pl.BlockSpec((1, tp, 2 * Cout), lambda n, r: (n, r, 0)),
        ),
        compiler_params=pltpu.CompilerParams(
            dimension_semantics=("parallel", "parallel"),
            vmem_limit_bytes=vmem_limit),
    )(x_pad, w_s, m_mix, b_mix)

    # --- glue: lane-dense (N, P, 2*Cout) slab back to PyTorch NCDHW ---
    # TODO(synk): if downstream ops accept channels-last this transpose should be
    #             folded into the consumer instead of paying an extra HBM pass.
    out = out.reshape(N, hout_p, wout_p, 2, Cout)[:, :hout, :wout]   # drop tile padding
    return jnp.transpose(out, (0, 4, 3, 1, 2))                       # (N, Cout, 2, hout, wout)


def _reference_forward(x, w2d, bias, w1, w2, w3, padding=(1, 1)):
    """Pure-JAX reference matching the PyTorch forward."""
    ph, pw = padding
    outs = []
    for t in range(x.shape[2]):
        y = jax.lax.conv_general_dilated(
            x[:, :, t], w2d, window_strides=(1, 1),
            padding=[(ph, ph), (pw, pw)],
            dimension_numbers=("NCHW", "OIHW", "NCHW"))
        outs.append(y + bias[None, :, None, None])
    s0, s1 = outs

    def mix(a, wmat):  # 1x1x1 conv: out[o] = sum_i W[o,i] * in[i]
        return jnp.einsum("oi,nihw->nohw", wmat, a)

    y0 = mix(s0, w2) + mix(s1, w3)
    y1 = mix(s0, w1) + mix(s1, w2)
    return jnp.stack([y0, y1], axis=2)


if __name__ == "__main__":
    key = jax.random.PRNGKey(0)
    k_x, k_w, k_b, k_w1, k_w2, k_w3 = jax.random.split(key, 6)

    # Odd spatial size on purpose: exercises the row/col tile padding paths.
    N, Cin, Cout, T, H, W = 2, 4, 8, 2, 15, 15
    kh = kw = 3
    padding = (1, 1)

    x = jax.random.normal(k_x, (N, Cin, T, H, W), jnp.float32)
    w2d = jax.random.normal(k_w, (Cout, Cin, kh, kw), jnp.float32) * 0.1
    bias = jax.random.normal(k_b, (Cout,), jnp.float32) * 0.1
    # NOTE: the PyTorch module inits w1 = w3 = 0 and w2 = I (residual init);
    # random values here so the fused time-mix matmul is actually exercised.
    w1 = jax.random.normal(k_w1, (Cout, Cout), jnp.float32) * 0.1
    w2 = jax.random.normal(k_w2, (Cout, Cout), jnp.float32) * 0.1
    w3 = jax.random.normal(k_w3, (Cout, Cout), jnp.float32) * 0.1

    out = decompose_conv(x, w2d, bias, w1, w2, w3, padding=padding, block_rows=8)
    out = jax.block_until_ready(out)

    ref = _reference_forward(x, w2d, bias, w1, w2, w3, padding=padding)
    ref = jax.block_until_ready(ref)

    assert out.shape == (N, Cout, T, H, W), out.shape
    assert np.allclose(np.asarray(out), np.asarray(ref), rtol=2e-4, atol=2e-4), \
        "Pallas output does not match reference"

    print("KERNEL_OK")
</pallas_src>

<mosaic_0001>
module attributes {stable_mosaic.version = 11 : i64} {
  func.func @_decompose_conv_kernel(%arg0: i32, %arg1: i32, %arg2: memref<1x2x18x18x4xf32, #tpu.memory_space<vmem>>, %arg3: memref<3x3x4x8xf32, #tpu.memory_space<vmem>>, %arg4: memref<16x16xf32, #tpu.memory_space<vmem>>, %arg5: memref<1x16xf32, #tpu.memory_space<vmem>>, %arg6: memref<1x128x16xf32, #tpu.memory_space<vmem>>) attributes {dimension_semantics = [#tpu.dimension_semantics<parallel>, #tpu.dimension_semantics<parallel>], iteration_bounds = array<i64: 2, 2>, scalar_prefetch = 0 : i64, scratch_operands = 0 : i64, tpu.core_type = #tpu.core_type<tc>, window_params = [{transform_indices = @transform_0, window_bounds = array<i64: 1, 2, 18, 18, 4>}, {pipeline_mode = #tpu.pipeline_mode<synchronous>, transform_indices = @transform_1, window_bounds = array<i64: 3, 3, 4, 8>}, {pipeline_mode = #tpu.pipeline_mode<synchronous>, transform_indices = @transform_2, window_bounds = array<i64: 16, 16>}, {pipeline_mode = #tpu.pipeline_mode<synchronous>, transform_indices = @transform_3, window_bounds = array<i64: 1, 16>}, {transform_indices = @transform_4, window_bounds = array<i64: 1, 128, 16>}]} {
    %c8_i32 = arith.constant 8 : i32
    %0 = arith.muli %arg1, %c8_i32 : i32
    %1 = tpu.assume_multiple %0, 8 : i32
    %c0_i32 = arith.constant 0 : i32
    %2 = arith.addi %1, %c0_i32 : i32
    %c0 = arith.constant 0 : index
    %c0_0 = arith.constant 0 : index
    %3 = arith.index_cast %2 : i32 to index
    %c0_1 = arith.constant 0 : index
    %c0_2 = arith.constant 0 : index
    %4 = vector.load %arg2[%c0, %c0_0, %3, %c0_1, %c0_2] : memref<1x2x18x18x4xf32, #tpu.memory_space<vmem>>, vector<1x2x8x16x4xf32>
    %5 = vector.shape_cast %4 : vector<1x2x8x16x4xf32> to vector<2x8x16x4xf32>
    %6 = vector.shape_cast %5 : vector<2x8x16x4xf32> to vector<256x4xf32>
    %c0_3 = arith.constant 0 : index
    %c0_4 = arith.constant 0 : index
    %c0_5 = arith.constant 0 : index
    %c0_6 = arith.constant 0 : index
    %7 = vector.load %arg3[%c0_3, %c0_4, %c0_5, %c0_6] : memref<3x3x4x8xf32, #tpu.memory_space<vmem>>, vector<1x1x4x8xf32>
    %8 = vector.shape_cast %7 : vector<1x1x4x8xf32> to vector<4x8xf32>
    %cst = arith.constant dense<0.000000e+00> : vector<256x8xf32>
    %9 = tpu.matmul %6, %8, %cst {dimension_numbers = #tpu.dot_dimension_numbers<[1], [0], [0], [1], [0, 0, 1, 1], [], []>} : vector<256x4xf32>, vector<4x8xf32>, vector<256x8xf32> -> vector<256x8xf32>
    %c0_i32_7 = arith.constant 0 : i32
    %10 = arith.addi %1, %c0_i32_7 : i32
    %c0_8 = arith.constant 0 : index
    %c0_9 = arith.constant 0 : index
    %11 = arith.index_cast %10 : i32 to index
    %c1 = arith.constant 1 : index
    %c0_10 = arith.constant 0 : index
    %12 = vector.load %arg2[%c0_8, %c0_9, %11, %c1, %c0_10] : memref<1x2x18x18x4xf32, #tpu.memory_space<vmem>>, vector<1x2x8x16x4xf32>
    %13 = vector.shape_cast %12 : vector<1x2x8x16x4xf32> to vector<2x8x16x4xf32>
    %14 = vector.shape_cast %13 : vector<2x8x16x4xf32> to vector<256x4xf32>
    %c0_11 = arith.constant 0 : index
    %c1_12 = arith.constant 1 : index
    %c0_13 = arith.constant 0 : index
    %c0_14 = arith.constant 0 : index
    %15 = vector.load %arg3[%c0_11, %c1_12, %c0_13, %c0_14] : memref<3x3x4x8xf32, #tpu.memory_space<vmem>>, vector<1x1x4x8xf32>
    %16 = vector.shape_cast %15 : vector<1x1x4x8xf32> to vector<4x8xf32>
    %cst_15 = arith.constant dense<0.000000e+00> : vector<256x8xf32>
    %17 = tpu.matmul %14, %16, %cst_15 {dimension_numbers = #tpu.dot_dimension_numbers<[1], [0], [0], [1], [0, 0, 1, 1], [], []>} : vector<256x4xf32>, vector<4x8xf32>, vector<256x8xf32> -> vector<256x8xf32>
    %18 = arith.addf %9, %17 : vector<256x8xf32>
    %c0_i32_16 = arith.constant 0 : i32
    %19 = arith.addi %1, %c0_i32_16 : i32
    %c0_17 = arith.constant 0 : index
    %c0_18 = arith.constant 0 : index
    %20 = arith.index_cast %19 : i32 to index
    %c2 = arith.constant 2 : index
    %c0_19 = arith.constant 0 : index
    %21 = vector.load %arg2[%c0_17, %c0_18, %20, %c2, %c0_19] : memref<1x2x18x18x4xf32, #tpu.memory_space<vmem>>, vector<1x2x8x16x4xf32>
    %22 = vector.shape_cast %21 : vector<1x2x8x16x4xf32> to vector<2x8x16x4xf32>
    %23 = vector.shape_cast %22 : vector<2x8x16x4xf32> to vector<256x4xf32>
    %c0_20 = arith.constant 0 : index
    %c2_21 = arith.constant 2 : index
    %c0_22 = arith.constant 0 : index
    %c0_23 = arith.constant 0 : index
    %24 = vector.load %arg3[%c0_20, %c2_21, %c0_22, %c0_23] : memref<3x3x4x8xf32, #tpu.memory_space<vmem>>, vector<1x1x4x8xf32>
    %25 = vector.shape_cast %24 : vector<1x1x4x8xf32> to vector<4x8xf32>
    %cst_24 = arith.constant dense<0.000000e+00> : vector<256x8xf32>
    %26 = tpu.matmul %23, %25, %cst_24 {dimension_numbers = #tpu.dot_dimension_numbers<[1], [0], [0], [1], [0, 0, 1, 1], [], []>} : vector<256x4xf32>, vector<4x8xf32>, vector<256x8xf32> -> vector<256x8xf32>
    %27 = arith.addf %18, %26 : vector<256x8xf32>
    %c1_i32 = arith.constant 1 : i32
    %28 = arith.addi %1, %c1_i32 : i32
    %c0_25 = arith.constant 0 : index
    %c0_26 = arith.constant 0 : index
    %29 = arith.index_cast %28 : i32 to index
    %c0_27 = arith.constant 0 : index
    %c0_28 = arith.constant 0 : index
    %30 = vector.load %arg2[%c0_25, %c0_26, %29, %c0_27, %c0_28] : memref<1x2x18x18x4xf32, #tpu.memory_space<vmem>>, vector<1x2x8x16x4xf32>
    %31 = vector.shape_cast %30 : vector<1x2x8x16x4xf32> to vector<2x8x16x4xf32>
    %32 = vector.shape_cast %31 : vector<2x8x16x4xf32> to vector<256x4xf32>
    %c1_29 = arith.constant 1 : index
    %c0_30 = arith.constant 0 : index
    %c0_31 = arith.constant 0 : index
    %c0_32 = arith.constant 0 : index
    %33 = vector.load %arg3[%c1_29, %c0_30, %c0_31, %c0_32] : memref<3x3x4x8xf32, #tpu.memory_space<vmem>>, vector<1x1x4x8xf32>
    %34 = vector.shape_cast %33 : vector<1x1x4x8xf32> to vector<4x8xf32>
    %cst_33 = arith.constant dense<0.000000e+00> : vector<256x8xf32>
    %35 = tpu.matmul %32, %34, %cst_33 {dimension_numbers = #tpu.dot_dimension_numbers<[1], [0], [0], [1], [0, 0, 1, 1], [], []>} : vector<256x4xf32>, vector<4x8xf32>, vector<256x8xf32> -> vector<256x8xf32>
    %36 = arith.addf %27, %35 : vector<256x8xf32>
    %c1_i32_34 = arith.constant 1 : i32
    %37 = arith.addi %1, %c1_i32_34 : i32
    %c0_35 = arith.constant 0 : index
    %c0_36 = arith.constant 0 : index
    %38 = arith.index_cast %37 : i32 to index
    %c1_37 = arith.constant 1 : index
    %c0_38 = arith.constant 0 : index
    %39 = vector.load %arg2[%c0_35, %c0_36, %38, %c1_37, %c0_38] : memref<1x2x18x18x4xf32, #tpu.memory_space<vmem>>, vector<1x2x8x16x4xf32>
    %40 = vector.shape_cast %39 : vector<1x2x8x16x4xf32> to vector<2x8x16x4xf32>
    %41 = vector.shape_cast %40 : vector<2x8x16x4xf32> to vector<256x4xf32>
    %c1_39 = arith.constant 1 : index
    %c1_40 = arith.constant 1 : index
    %c0_41 = arith.constant 0 : index
    %c0_42 = arith.constant 0 : index
    %42 = vector.load %arg3[%c1_39, %c1_40, %c0_41, %c0_42] : memref<3x3x4x8xf32, #tpu.memory_space<vmem>>, vector<1x1x4x8xf32>
    %43 = vector.shape_cast %42 : vector<1x1x4x8xf32> to vector<4x8xf32>
    %cst_43 = arith.constant dense<0.000000e+00> : vector<256x8xf32>
    %44 = tpu.matmul %41, %43, %cst_43 {dimension_numbers = #tpu.dot_dimension_numbers<[1], [0], [0], [1], [0, 0, 1, 1], [], []>} : vector<256x4xf32>, vector<4x8xf32>, vector<256x8xf32> -> vector<256x8xf32>
    %45 = arith.addf %36, %44 : vector<256x8xf32>
    %c1_i32_44 = arith.constant 1 : i32
    %46 = arith.addi %1, %c1_i32_44 : i32
    %c0_45 = arith.constant 0 : index
    %c0_46 = arith.constant 0 : index
    %47 = arith.index_cast %46 : i32 to index
    %c2_47 = arith.constant 2 : index
    %c0_48 = arith.constant 0 : index
    %48 = vector.load %arg2[%c0_45, %c0_46, %47, %c2_47, %c0_48] : memref<1x2x18x18x4xf32, #tpu.memory_space<vmem>>, vector<1x2x8x16x4xf32>
    %49 = vector.shape_cast %48 : vector<1x2x8x16x4xf32> to vector<2x8x16x4xf32>
    %50 = vector.shape_cast %49 : vector<2x8x16x4xf32> to vector<256x4xf32>
    %c1_49 = arith.constant 1 : index
    %c2_50 = arith.constant 2 : index
    %c0_51 = arith.constant 0 : index
    %c0_52 = arith.constant 0 : index
    %51 = vector.load %arg3[%c1_49, %c2_50, %c0_51, %c0_52] : memref<3x3x4x8xf32, #tpu.memory_space<vmem>>, vector<1x1x4x8xf32>
    %52 = vector.shape_cast %51 : vector<1x1x4x8xf32> to vector<4x8xf32>
    %cst_53 = arith.constant dense<0.000000e+00> : vector<256x8xf32>
    %53 = tpu.matmul %50, %52, %cst_53 {dimension_numbers = #tpu.dot_dimension_numbers<[1], [0], [0], [1], [0, 0, 1, 1], [], []>} : vector<256x4xf32>, vector<4x8xf32>, vector<256x8xf32> -> vector<256x8xf32>
    %54 = arith.addf %45, %53 : vector<256x8xf32>
    %c2_i32 = arith.constant 2 : i32
    %55 = arith.addi %1, %c2_i32 : i32
    %c0_54 = arith.constant 0 : index
    %c0_55 = arith.constant 0 : index
    %56 = arith.index_cast %55 : i32 to index
    %c0_56 = arith.constant 0 : index
    %c0_57 = arith.constant 0 : index
    %57 = vector.load %arg2[%c0_54, %c0_55, %56, %c0_56, %c0_57] : memref<1x2x18x18x4xf32, #tpu.memory_space<vmem>>, vector<1x2x8x16x4xf32>
    %58 = vector.shape_cast %57 : vector<1x2x8x16x4xf32> to vector<2x8x16x4xf32>
    %59 = vector.shape_cast %58 : vector<2x8x16x4xf32> to vector<256x4xf32>
    %c2_58 = arith.constant 2 : index
    %c0_59 = arith.constant 0 : index
    %c0_60 = arith.constant 0 : index
    %c0_61 = arith.constant 0 : index
    %60 = vector.load %arg3[%c2_58, %c0_59, %c0_60, %c0_61] : memref<3x3x4x8xf32, #tpu.memory_space<vmem>>, vector<1x1x4x8xf32>
    %61 = vector.shape_cast %60 : vector<1x1x4x8xf32> to vector<4x8xf32>
    %cst_62 = arith.constant dense<0.000000e+00> : vector<256x8xf32>
    %62 = tpu.matmul %59, %61, %cst_62 {dimension_numbers = #tpu.dot_dimension_numbers<[1], [0], [0], [1], [0, 0, 1, 1], [], []>} : vector<256x4xf32>, vector<4x8xf32>, vector<256x8xf32> -> vector<256x8xf32>
    %63 = arith.addf %54, %62 : vector<256x8xf32>
    %c2_i32_63 = arith.constant 2 : i32
    %64 = arith.addi %1, %c2_i32_63 : i32
    %c0_64 = arith.constant 0 : index
    %c0_65 = arith.constant 0 : index
    %65 = arith.index_cast %64 : i32 to index
    %c1_66 = arith.constant 1 : index
    %c0_67 = arith.constant 0 : index
    %66 = vector.load %arg2[%c0_64, %c0_65, %65, %c1_66, %c0_67] : memref<1x2x18x18x4xf32, #tpu.memory_space<vmem>>, vector<1x2x8x16x4xf32>
    %67 = vector.shape_cast %66 : vector<1x2x8x16x4xf32> to vector<2x8x16x4xf32>
    %68 = vector.shape_cast %67 : vector<2x8x16x4xf32> to vector<256x4xf32>
    %c2_68 = arith.constant 2 : index
    %c1_69 = arith.constant 1 : index
    %c0_70 = arith.constant 0 : index
    %c0_71 = arith.constant 0 : index
    %69 = vector.load %arg3[%c2_68, %c1_69, %c0_70, %c0_71] : memref<3x3x4x8xf32, #tpu.memory_space<vmem>>, vector<1x1x4x8xf32>
    %70 = vector.shape_cast %69 : vector<1x1x4x8xf32> to vector<4x8xf32>
    %cst_72 = arith.constant dense<0.000000e+00> : vector<256x8xf32>
    %71 = tpu.matmul %68, %70, %cst_72 {dimension_numbers = #tpu.dot_dimension_numbers<[1], [0], [0], [1], [0, 0, 1, 1], [], []>} : vector<256x4xf32>, vector<4x8xf32>, vector<256x8xf32> -> vector<256x8xf32>
    %72 = arith.addf %63, %71 : vector<256x8xf32>
    %c2_i32_73 = arith.constant 2 : i32
    %73 = arith.addi %1, %c2_i32_73 : i32
    %c0_74 = arith.constant 0 : index
    %c0_75 = arith.constant 0 : index
    %74 = arith.index_cast %73 : i32 to index
    %c2_76 = arith.constant 2 : index
    %c0_77 = arith.constant 0 : index
    %75 = vector.load %arg2[%c0_74, %c0_75, %74, %c2_76, %c0_77] : memref<1x2x18x18x4xf32, #tpu.memory_space<vmem>>, vector<1x2x8x16x4xf32>
    %76 = vector.shape_cast %75 : vector<1x2x8x16x4xf32> to vector<2x8x16x4xf32>
    %77 = vector.shape_cast %76 : vector<2x8x16x4xf32> to vector<256x4xf32>
    %c2_78 = arith.constant 2 : index
    %c2_79 = arith.constant 2 : index
    %c0_80 = arith.constant 0 : index
    %c0_81 = arith.constant 0 : index
    %78 = vector.load %arg3[%c2_78, %c2_79, %c0_80, %c0_81] : memref<3x3x4x8xf32, #tpu.memory_space<vmem>>, vector<1x1x4x8xf32>
    %79 = vector.shape_cast %78 : vector<1x1x4x8xf32> to vector<4x8xf32>
    %cst_82 = arith.constant dense<0.000000e+00> : vector<256x8xf32>
    %80 = tpu.matmul %77, %79, %cst_82 {dimension_numbers = #tpu.dot_dimension_numbers<[1], [0], [0], [1], [0, 0, 1, 1], [], []>} : vector<256x4xf32>, vector<4x8xf32>, vector<256x8xf32> -> vector<256x8xf32>
    %81 = arith.addf %72, %80 : vector<256x8xf32>
    %82 = vector.extract_strided_slice %81 {offsets = [0, 0], sizes = [128, 8], strides = [1, 1]} : vector<256x8xf32> to vector<128x8xf32>
    %83 = vector.extract_strided_slice %81 {offsets = [128, 0], sizes = [128, 8], strides = [1, 1]} : vector<256x8xf32> to vector<128x8xf32>
    %84 = tpu.concatenate %82, %83 in 1 : vector<128x8xf32>, vector<128x8xf32> -> vector<128x16xf32>
    %c0_83 = arith.constant 0 : index
    %c0_84 = arith.constant 0 : index
    %85 = vector.load %arg4[%c0_83, %c0_84] : memref<16x16xf32, #tpu.memory_space<vmem>>, vector<16x16xf32>
    %cst_85 = arith.constant dense<0.000000e+00> : vector<128x16xf32>
    %86 = tpu.matmul %84, %85, %cst_85 {dimension_numbers = #tpu.dot_dimension_numbers<[1], [0], [0], [1], [0, 0, 1, 1], [], []>} : vector<128x16xf32>, vector<16x16xf32>, vector<128x16xf32> -> vector<128x16xf32>
    %c0_86 = arith.constant 0 : index
    %c0_87 = arith.constant 0 : index
    %87 = vector.load %arg5[%c0_86, %c0_87] : memref<1x16xf32, #tpu.memory_space<vmem>>, vector<1x16xf32>
    %88 = vector.broadcast %87 : vector<1x16xf32> to vector<128x16xf32>
    %89 = arith.addf %86, %88 : vector<128x16xf32>
    %c0_88 = arith.constant 0 : index
    %c0_89 = arith.constant 0 : index
    %c0_90 = arith.constant 0 : index
    %90 = vector.load %arg6[%c0_88, %c0_89, %c0_90] : memref<1x128x16xf32, #tpu.memory_space<vmem>>, vector<1x128x16xf32>
    %91 = vector.shape_cast %90 : vector<1x128x16xf32> to vector<128x16xf32>
    %92 = vector.shape_cast %89 : vector<128x16xf32> to vector<1x128x16xf32>
    tpu.vector_store %arg6[%c0_88, %c0_89, %c0_90], %92 {strides = array<i32>} : memref<1x128x16xf32, #tpu.memory_space<vmem>>, vector<1x128x16xf32>,
    return
  }
  func.func @transform_0(%arg0: i32, %arg1: i32) -> (i32, i32, i32, i32, i32) {
    %c0_i32 = arith.constant 0 : i32
    %c0_i32_0 = arith.constant 0 : i32
    %c0_i32_1 = arith.constant 0 : i32
    %c0_i32_2 = arith.constant 0 : i32
    %c0_i32_3 = arith.constant 0 : i32
    return %arg0, %c0_i32, %c0_i32_0, %c0_i32_1, %c0_i32_2 : i32, i32, i32, i32, i32
  }
  func.func @transform_1(%arg0: i32, %arg1: i32) -> (i32, i32, i32, i32) {
    %c0_i32 = arith.constant 0 : i32
    %c0_i32_0 = arith.constant 0 : i32
    %c0_i32_1 = arith.constant 0 : i32
    %c0_i32_2 = arith.constant 0 : i32
    %c0_i32_3 = arith.constant 0 : i32
    return %c0_i32, %c0_i32_0, %c0_i32_1, %c0_i32_2 : i32, i32, i32, i32
  }
  func.func @transform_2(%arg0: i32, %arg1: i32) -> (i32, i32) {
    %c0_i32 = arith.constant 0 : i32
    %c0_i32_0 = arith.constant 0 : i32
    %c0_i32_1 = arith.constant 0 : i32
    return %c0_i32, %c0_i32_0 : i32, i32
  }
  func.func @transform_3(%arg0: i32, %arg1: i32) -> (i32, i32) {
    %c0_i32 = arith.constant 0 : i32
    %c0_i32_0 = arith.constant 0 : i32
    %c0_i32_1 = arith.constant 0 : i32
    return %c0_i32, %c0_i32_0 : i32, i32
  }
  func.func @transform_4(%arg0: i32, %arg1: i32) -> (i32, i32, i32) {
    %c0_i32 = arith.constant 0 : i32
    %c0_i32_0 = arith.constant 0 : i32
    return %arg0, %arg1, %c0_i32 : i32, i32, i32
  }
}

</mosaic_0001>

<bundles_post_ra>
// kernel: tpu_custom_call.1
= control target key start
LH: loop header
LB: loop body
LE: loop exit
PB: predicated region body
PF: predicated region fallthrough
CT: control target
= control target key end

     0   :  { %s3622_s15 = smov 0   ;;  %s3624_s16 = smov 0   ;;  %s5040_s0 = inlined_call_operand.vmem [shape: f32[2,2,18,18,4], index: 0, kind: input, shape index: {}]   ;;  %s5041_s1 = inlined_call_operand.vmem [shape: f32[3,3,4,8], index: 1, kind: input, shape index: {}]   ;;  %s5042_s2 = inlined_call_operand.vmem [shape: f32[16,16], index: 2, kind: input, shape index: {}]   ;;  %s5043_s3 = inlined_call_operand.vmem [shape: f32[1,16], index: 3, kind: input, shape index: {}]   ;;  %s5044_s4 = inlined_call_operand.vmem [shape: f32[2,256,16], index: 4, kind: output, shape index: {}]  }
   0x1   :  { %s3626_s17 = smov 0   ;;  %s3628_s18 = smov 0  }
   0x2   :  { %s3630_s19 = smov 0  }
   0x3 LB: > { %s23_s20 = sadd.s32 1, %s3586_s17  ;;  %s26_s21 = sadd.s32 1, %s3590_s18  ;;  %s3594_s19 = sphi %s3630_s19, %s14_s19   ;;  %s3590_s18 = sphi %s3628_s18, %s5148_s18   ;;  %s3586_s17 = sphi %s3626_s17, %s5147_s17   ;;  %s3582_s16 = sphi %s3624_s16, %s5146_s16   ;;  %s3578_s15 = sphi %s3622_s15, %s5145_s15  }
   0x4   : > { %p24_p0 = scmp.ge.s32.totalorder %s23_s20, 2  ;;  %p2984_p1 = scmp.ge.s32.totalorder %s3594_s19, 1 }
   0x5   : > { %p176_p2 = scmp.lt.s32.totalorder %s3594_s19, 5 }
   0x6   : > { %s5150_s20 = smov (%p24_p0, %s23_s20), 0  ;;  %s5152_s21 = smov (!%p24_p0, %s26_s21), %s3590_s18 }
   0x7   : > { %p177_p3 = pnand %p2984_p1, %p176_p2  ;;  %p28_p4 = scmp.ge.s32.totalorder %s5152_s21, 2 }
   0x9   : > { %s5154_s21 = smov (%p28_p4, %s5152_s21), 0  ;;  %180 = sbr.rel (%p177_p3) target bundleno = 1005 (0x3ed), region = 36 }
   0xe   : > { %v2991_v0 = vld [vmem:[%s5041_s1 + $0x4] sm:$0xf]  ;;  %vm388_vm0 = vcmask 1043456   ;;  %v256_v1 = vld [vmem:[%s5041_s1] sm:$0xf]  ;;  %p206_p5 = scmp.lt.s32.totalorder %s3582_s16, 1 }
   0xf   : > { %3510 = vmatpush.msk.msra.mxu2 %vm388_vm0, %v2991_v0  ;;  %3511 = vmatpush.msk.msra.mxu3 %vm388_vm0, %v2991_v0  ;;  %v3058_v2 = vld [vmem:[%s5041_s1 + $0x8] sm:$0xf]  ;;  %v3192_v3 = vld [vmem:[%s5041_s1 + $0x10] sm:$0xf]  ;;  %s2990_s30 = smul.u32 192, %s3578_s15  ;;  %vm291_vm1 = vcmask 31744  }
  0x10   : > { %3025 = vmatpush.msk.msra.mxu1 %vm388_vm0, %v256_v1  ;;  %s5156_s16 = smov (!%p206_p5, %s3582_s16), 1  ;;  %2992 = vmatpush.msk.msra.mxu0 %vm388_vm0, %v2991_v0  ;;  %v3126_v24 = vld [vmem:[%s5041_s1 + $0xc] sm:$0xf]  ;;  %v3326_v41 = vld [vmem:[%s5041_s1 + $0x18] sm:$0xf]  ;;  %vm2733_vm2 = vcmask 64512  }
  0x11   : > { %3059 = vmatpush.msk.msrb.mxu2 %vm388_vm0, %v3058_v2  ;;  %3512 = vmatpush.msk.msrb.mxu3 %vm388_vm0, %v256_v1  ;;  %s3513_s5 = smul.u32 864, %s5156_s16  ;;  %v3392_v42 = vld [vmem:[%s5041_s1 + $0x1c] sm:$0xf]  ;;  %v3458_v47 = vld [vmem:[%s5041_s1 + $0x20] sm:$0xf]  ;;  %vm2756_vm3 = vcmask 130048  }
  0x12   : > { %3193 = vmatpush.msk.msrb.mxu0 %vm388_vm0, %v3192_v3  ;;  %v3258_v58 = vld [vmem:[%s5041_s1 + $0x14] sm:$0xf]  ;;  %s2986_s6 = sshll.u32 %s3578_s15, 4  ;;  %s2987_s7 = sshll.u32 %s5156_s16, 5 }
  0x13   : > { %s210_s8 = scalar_lea.vmem %s5040_s0, %s3513_s5  ;;  %3259 = vmatpush.msk.msrb.mxu1 %vm388_vm0, %v3258_v58  ;;  %s3596_s5 = smov 8  }
  0x14   : > { %s3680_s9 = scalar_lea.vmem %s210_s8, %s2990_s30  ;;  %p214_p6 = scmp.lt.s32.totalorder %s2986_s6, 31 }
  0x15   : > { %v3683_v4 = vld [vmem:[%s3680_s9 + $0x91] sm:$0xff]  ;;  %v224_v6 = vld [vmem:[%s3680_s9] sm:$0xff]  ;;  %v225_v10 = vld [vmem:[%s3680_s9 + $0x8] sm:$0xff] }
  0x16   : > { %v3686_v5 = vld [vmem:[%s3680_s9 + $0x211] sm:$0xff]  ;;  %3005 = vmatmul.msk.f32.vlgmr.msra.gmra.mxu2 %vm291_vm1, %v3683_v4  ;;  %3026 = vmatmul.msk.f32.vlgmr.msra.gmra.mxu1 %vm291_vm1, %v224_v6  ;;  %v257_v7 = vld [vmem:[%s3680_s9 + $0x1] sm:$0xff]  ;;  %v3697_v8 = vld [vmem:[%s3680_s9 + $0x99] sm:$0xff]  ;;  %s5158_s6 = smov (!%p214_p6, %s2986_s6), 31 }
  0x17   : > { %3017 = vmatmul.msk.f32.vlgmr.msra.gmra.mxu3 %vm291_vm1, %v3686_v5  ;;  %2993 = vmatmul.msk.f32.vlgmr.msra.gmra.mxu0 %vm291_vm1, %v257_v7  ;;  %v3700_v9 = vld [vmem:[%s3680_s9 + $0x219] sm:$0xff]  ;;  %v258_v11 = vld [vmem:[%s3680_s9 + $0x9] sm:$0xff]  ;;  %v3731_v16 = vld [vmem:[%s3680_s9 + $0xb1] sm:$0xff]  ;;  %s217_s8 = sadd.s32 %s2987_s7, %s5158_s6 }
  0x18   : > { %v3711_v12 = vld [vmem:[%s3680_s9 + $0xa9] sm:$0xff]  ;;  %v3717_v14 = vld [vmem:[%s3680_s9 + $0x18] sm:$0xff]  ;;  %v3737_v18 = vld [vmem:[%s3680_s9 + $0x20] sm:$0xff]  ;;  %3127 = vmatpush.msk.msra.mxu3 %vm388_vm0, %v3126_v24  ;;  %3327 = vmatpush.msk.msra.mxu2 %vm388_vm0, %v3326_v41 }
  0x19   : > { %v3714_v13 = vld [vmem:[%s3680_s9 + $0x229] sm:$0xff]  ;;  %v3720_v15 = vld [vmem:[%s3680_s9 + $0x19] sm:$0xff]  ;;  %v3734_v17 = vld [vmem:[%s3680_s9 + $0x231] sm:$0xff]  ;;  %3459 = vmatpush.msk.msra.mxu0 %vm388_vm0, %v3458_v47 }
  0x1a   : > { %v3740_v19 = vld [vmem:[%s3680_s9 + $0x21] sm:$0xff]  ;;  %v273_v20 = vld [vmem:[%s3680_s9 + $0x1b1] sm:$0xff]  ;;  %v274_v25 = vld [vmem:[%s3680_s9 + $0x1b9] sm:$0xff] }
  0x1b   : > { %v3752_v21 = vld [vmem:[%s3680_s9 + $0x241] sm:$0xff]  ;;  %v3755_v22 = vld [vmem:[%s3680_s9 + $0x30] sm:$0xff]  ;;  %v3776_v27 = vld [vmem:[%s3680_s9 + $0x38] sm:$0xff] }
  0x1c   : > { %5063 = vst [vmem:[#allocation2_spill] sm:$0xff] %v3752_v21  ;;  %v3758_v23 = vld [vmem:[%s3680_s9 + $0x31] sm:$0xff]  ;;  %v3773_v26 = vld [vmem:[%s3680_s9 + $0x249] sm:$0xff]  ;;  %v3779_v28 = vld [vmem:[%s3680_s9 + $0x39] sm:$0xff] }
  0x1d   : > { %5064 = vst [vmem:[#allocation3_spill] sm:$0xff] %v3773_v26  ;;  %v3789_v29 = vld [vmem:[%s3680_s9 + $0x1c9] sm:$0xff]  ;;  %v3792_v30 = vld [vmem:[%s3680_s9 + $0x259] sm:$0xff]  ;;  %v3809_v33 = vld [vmem:[%s3680_s9 + $0x1d1] sm:$0xff] }
  0x1e   : > { %3006 = vmatmul.msk.f32.gmra.mxu2 %vm291_vm1, %v3697_v8  ;;  %3027 = vmatmul.msk.f32.gmra.mxu1 %vm291_vm1, %v225_v10  ;;  %5065 = vst [vmem:[#allocation4_spill] sm:$0xff] %v3792_v30  ;;  %v3795_v31 = vld [vmem:[%s3680_s9 + $0x48] sm:$0xff]  ;;  %v3815_v35 = vld [vmem:[%s3680_s9 + $0x50] sm:$0xff]  ;;  %v3832_v38 = vld [vmem:[%s3680_s9 + $0x240] sm:$0xff] }
  0x1f   : > { %3018 = vmatmul.msk.f32.gmra.mxu3 %vm291_vm1, %v3700_v9  ;;  %2994 = vmatmul.msk.f32.gmra.mxu0 %vm291_vm1, %v258_v11  ;;  %v3798_v32 = vld [vmem:[%s3680_s9 + $0x49] sm:$0xff]  ;;  %v3812_v34 = vld [vmem:[%s3680_s9 + $0x261] sm:$0xff]  ;;  %v3818_v36 = vld [vmem:[%s3680_s9 + $0x51] sm:$0xff] }
  0x20   : > { %5066 = vst [vmem:[#allocation5_spill] sm:$0xff] %v3812_v34  ;;  %v3829_v37 = vld [vmem:[%s3680_s9 + $0x1e1] sm:$0xff]  ;;  %v3857_v43 = vld [vmem:[%s3680_s9 + $0x1e9] sm:$0xff]  ;;  %v3881_v48 = vld [vmem:[%s3680_s9 + $0x1f9] sm:$0xff] }
  0x21   : > { %v3835_v39 = vld [vmem:[%s3680_s9 + $0x60] sm:$0xff]  ;;  %v3860_v44 = vld [vmem:[%s3680_s9 + $0x248] sm:$0xff]  ;;  %v3884_v49 = vld [vmem:[%s3680_s9 + $0x258] sm:$0xff] }
  0x22   : > { %v3838_v40 = vld [vmem:[%s3680_s9 + $0x61] sm:$0xff]  ;;  %5067 = vst [vmem:[#allocation6_spill] sm:$0xff] %v3860_v44  ;;  %v3866_v46 = vld [vmem:[%s3680_s9 + $0x69] sm:$0xff]  ;;  %v3887_v50 = vld [vmem:[%s3680_s9 + $0x78] sm:$0xff] }
  0x23   : > { %v3863_v45 = vld [vmem:[%s3680_s9 + $0x68] sm:$0xff]  ;;  %5068 = vst [vmem:[#allocation7_spill] sm:$0xff] %v3884_v49  ;;  %v3890_v51 = vld [vmem:[%s3680_s9 + $0x79] sm:$0xff]  ;;  %v3922_v57 = vld [vmem:[%s3680_s9 + $0x90] sm:$0xff] }
  0x24   : > { %v3901_v52 = vld [vmem:[%s3680_s9 + $0x201] sm:$0xff]  ;;  %v718_v59 = vld [vmem:[%s3680_s9 + $0xa] sm:$0xff]  ;;  %v3937_v60 = vld [vmem:[%s3680_s9 + $0x98] sm:$0xff] }
  0x25   : > { %v3904_v53 = vld [vmem:[%s3680_s9 + $0x260] sm:$0xff]  ;;  %v3950_v62 = vld [vmem:[%s3680_s9 + $0xa8] sm:$0xff]  ;;  %v3964_v0 = vld [vmem:[%s3680_s9 + $0xb0] sm:$0xff] }
  0x26   : > { %3007 = vmatmul.msk.f32.gmra.mxu2 %vm291_vm1, %v3711_v12  ;;  %3028 = vmatmul.msk.f32.gmra.mxu1 %vm291_vm1, %v3717_v14  ;;  %5069 = vst [vmem:[#allocation8_spill] sm:$0xff] %v3904_v53  ;;  %v3907_v54 = vld [vmem:[%s3680_s9 + $0x80] sm:$0xff]  ;;  %v3975_v1 = vld [vmem:[%s3680_s9 + $0x32] sm:$0xff]  ;;  %v4018_v24 = vld [vmem:[%s3680_s9 + $0x1c8] sm:$0xff] }
  0x27   : > { %3019 = vmatmul.msk.f32.gmra.mxu3 %vm291_vm1, %v3714_v13  ;;  %2995 = vmatmul.msk.f32.gmra.mxu0 %vm291_vm1, %v3720_v15  ;;  %v3910_v55 = vld [vmem:[%s3680_s9 + $0x81] sm:$0xff]  ;;  %v240_v3 = vld [vmem:[%s3680_s9 + $0x1b0] sm:$0xff] }
  0x28   : > { %v717_v56 = vld [vmem:[%s3680_s9 + $0x2] sm:$0xff]  ;;  %v3947_v61 = vld [vmem:[%s3680_s9 + $0x1a] sm:$0xff]  ;;  %v4077_v58 = vld [vmem:[%s3680_s9 + $0x6a] sm:$0xff] }
  0x29   : > { %v3961_v63 = vld [vmem:[%s3680_s9 + $0x22] sm:$0xff]  ;;  %v3994_v11 = vld [vmem:[%s3680_s9 + $0x3a] sm:$0xff] }
  0x2a   : > { %v4057_v41 = vld [vmem:[%s3680_s9 + $0x62] sm:$0xff] }
  0x2e   : > { %3008 = vmatmul.msk.f32.gmra.mxu2 %vm291_vm1, %v3731_v16  ;;  %3029 = vmatmul.msk.f32.gmra.mxu1 %vm291_vm1, %v3737_v18 }
  0x2f   : > { %3020 = vmatmul.msk.f32.gmra.mxu3 %vm291_vm1, %v3734_v17  ;;  %2996 = vmatmul.msk.f32.gmra.mxu0 %vm291_vm1, %v3740_v19 }
  0x36   : > { %3009 = vmatmul.msk.f32.gmra.mxu2 %vm291_vm1, %v273_v20  ;;  %3030 = vmatmul.msk.f32.gmra.mxu1 %vm291_vm1, %v3755_v22 }
  0x37   : > { %3021 = vmatmul.msk.f32.gmra.mxu3 %vm291_vm1, %v3752_v21  ;;  %2997 = vmatmul.msk.f32.gmra.mxu0 %vm291_vm1, %v3758_v23 }
  0x3e   : > { %3010 = vmatmul.msk.f32.gmra.mxu2 %vm291_vm1, %v274_v25  ;;  %3031 = vmatmul.msk.f32.gmra.mxu1 %vm291_vm1, %v3776_v27 }
  0x3f   : > { %3022 = vmatmul.msk.f32.gmra.mxu3 %vm291_vm1, %v3773_v26  ;;  %2998 = vmatmul.msk.f32.gmra.mxu0 %vm291_vm1, %v3779_v28  ;;  %v4190_v26 = vld [vmem:[%s3680_s9 + $0xc1] sm:$0xff] }
  0x40   : > { %5089 = vst [vmem:[#allocation28_spill] sm:$0xff] %v4190_v26 }
  0x46   : > { %3011 = vmatmul.msk.f32.gmra.mxu2 %vm291_vm1, %v3789_v29  ;;  %3032 = vmatmul.msk.f32.gmra.mxu1 %vm291_vm1, %v3795_v31 }
  0x47   : > { %3023 = vmatmul.msk.f32.gmra.mxu3 %vm291_vm1, %v3792_v30  ;;  %2999 = vmatmul.msk.f32.gmra.mxu0 %vm291_vm1, %v3798_v32  ;;  %v4160_v30 = vld [vmem:[%s3680_s9 + $0x218] sm:$0xff] }
  0x4e   : > { %3012 = vmatmul.msk.f32.gmra.mxu2 %vm291_vm1, %v3809_v33  ;;  %3033 = vmatmul.msk.f32.gmra.mxu1 %vm291_vm1, %v3815_v35 }
  0x4f   : > { %3024 = vmatmul.msk.f32.gmra.mxu3 %vm291_vm1, %v3812_v34  ;;  %3000 = vmatmul.msk.f32.gmra.mxu0 %vm291_vm1, %v3818_v36 }
  0x56   : > { %3013 = vmatmul.msk.f32.gmra.mxu2 %vm291_vm1, %v3829_v37  ;;  %3034 = vmatmul.msk.f32.gmra.mxu1 %vm291_vm1, %v3835_v39 }
  0x57   : > { %3054 = vmatmul.msk.f32.vlgmr.msrb.gmra.mxu3 %vm291_vm1, %v3832_v38  ;;  %3001 = vmatmul.msk.f32.gmra.mxu0 %vm291_vm1, %v3838_v40 }
  0x58   : > { %3393 = vmatpush.msk.msrb.mxu3 %vm388_vm0, %v3392_v42  ;;  %v4060_v42 = vld [vmem:[%s3680_s9 + $0x1e0] sm:$0xff] }
  0x5e   : > { %3014 = vmatmul.msk.f32.gmra.mxu2 %vm291_vm1, %v3857_v43  ;;  %3035 = vmatmul.msk.f32.gmra.mxu1 %vm291_vm1, %v3863_v45 }
  0x5f   : > { %3055 = vmatmul.msk.f32.gmra.mxu3 %vm291_vm1, %v3860_v44  ;;  %3002 = vmatmul.msk.f32.gmra.mxu0 %vm291_vm1, %v3866_v46  ;;  %v4218_v44 = vld [vmem:[%s3680_s9 + $0xc9] sm:$0xff] }
  0x60   : > { %5095 = vst [vmem:[#allocation34_spill] sm:$0xff] %v4218_v44 }
  0x66   : > { %3015 = vmatmul.msk.f32.gmra.mxu2 %vm291_vm1, %v3881_v48  ;;  %3036 = vmatmul.msk.f32.gmra.mxu1 %vm291_vm1, %v3887_v50 }
  0x67   : > { %3056 = vmatmul.msk.f32.gmra.mxu3 %vm291_vm1, %v3884_v49  ;;  %3003 = vmatmul.msk.f32.gmra.mxu0 %vm291_vm1, %v3890_v51 }
  0x6e   : > { %3016 = vmatmul.msk.f32.gmra.mxu2 %vm291_vm1, %v3901_v52  ;;  %3037 = vmatmul.msk.f32.gmra.mxu1 %vm291_vm1, %v3907_v54 }
  0x6f   : > { %3057 = vmatmul.msk.f32.gmra.mxu3 %vm291_vm1, %v3904_v53  ;;  %3004 = vmatmul.msk.f32.gmra.mxu0 %vm291_vm1, %v3910_v55  ;;  %v4157_v53 = vld [vmem:[%s3680_s9 + $0x9a] sm:$0xff] }
  0x70   : > { %5084 = vst [vmem:[#allocation23_spill] sm:$0xff] %v4157_v53 }
  0x76   : > { %3060 = vmatmul.msk.f32.vlgmr.msrb.gmra.mxu2 %vm291_vm1, %v717_v56  ;;  %3038 = vmatmul.msk.f32.gmra.mxu1 %vm291_vm1, %v3922_v57 }
  0x77   : > { %3128 = vmatmul.msk.f32.vlgmr.msra.gmra.mxu3 %vm291_vm1, %v3717_v14  ;;  %3194 = vmatmul.msk.f32.vlgmr.msrb.gmra.mxu0 %vm291_vm1, %v3720_v15  ;;  %v241_v15 = vld [vmem:[%s3680_s9 + $0x1b8] sm:$0xff] }
  0x7e   : > { %3061 = vmatmul.msk.f32.gmra.mxu2 %vm291_vm1, %v718_v59  ;;  %3039 = vmatmul.msk.f32.gmra.mxu1 %vm291_vm1, %v3937_v60  ;;  %v4080_v59 = vld [vmem:[%s3680_s9 + $0x1e8] sm:$0xff] }
  0x7f   : > { %3129 = vmatmul.msk.f32.gmra.mxu3 %vm291_vm1, %v3737_v18  ;;  %3195 = vmatmul.msk.f32.gmra.mxu0 %vm291_vm1, %v3740_v19 }
  0x86   : > { %3062 = vmatmul.msk.f32.gmra.mxu2 %vm291_vm1, %v3947_v61  ;;  %3040 = vmatmul.msk.f32.gmra.mxu1 %vm291_vm1, %v3950_v62 }
  0x87   : > { %3130 = vmatmul.msk.f32.gmra.mxu3 %vm291_vm1, %v3755_v22  ;;  %3196 = vmatmul.msk.f32.gmra.mxu0 %vm291_vm1, %v3758_v23  ;;  %v4013_v22 = vld [vmem:[%s3680_s9 + $0x4a] sm:$0xff] }
  0x8e   : > { %3063 = vmatmul.msk.f32.gmra.mxu2 %vm291_vm1, %v3961_v63  ;;  %3041 = vmatmul.msk.f32.gmra.mxu1 %vm291_vm1, %v3964_v0 }
  0x8f   : > { %3131 = vmatmul.msk.f32.gmra.mxu3 %vm291_vm1, %v3776_v27  ;;  %3197 = vmatmul.msk.f32.gmra.mxu0 %vm291_vm1, %v3779_v28 }
  0x93   : > { %v3977_v2 = vpop.f32.mrf.mxu1 }
  0x94   : > { %v3980_v6 = vpop.f32.mrf.mxu0 }
  0x96   : > { %3064 = vmatmul.msk.f32.gmra.mxu2 %vm291_vm1, %v3975_v1  ;;  %3042 = vmatmul.msk.f32.gmra.mxu1 %vm291_vm1, %v240_v3 }
  0x97   : > { %3132 = vmatmul.msk.f32.gmra.mxu3 %vm291_vm1, %v3795_v31  ;;  %3198 = vmatmul.msk.f32.gmra.mxu0 %vm291_vm1, %v3798_v32  ;;  %v4035_v31 = vld [vmem:[%s3680_s9 + $0x52] sm:$0xff] }
  0x98   : > { %v4038_v32 = vld [vmem:[%s3680_s9 + $0x1d0] sm:$0xff] }
  0x99   : > { %v3989_v7 = vpop.f32.mrf.mxu2 }
  0x9a   : > { %5070 = vst [vmem:[#allocation9_spill] sm:$0xff] %v3989_v7  ;;  %v3991_v10 = vpop.f32.mrf.mxu3  ;;  %v4182_v7 = vld [vmem:[%s3680_s9 + $0xc0] sm:$0xff] }
  0x9b   : > { %5071 = vst [vmem:[#allocation10_spill] sm:$0xff] %v3991_v10  ;;  %v3996_v14 = vpop.f32.mrf.mxu1  ;;  %v4115_v10 = vld [vmem:[%s3680_s9 + $0x82] sm:$0xff] }
  0x9c   : > { %v3999_v18 = vpop.f32.mrf.mxu0  ;;  %5088 = vst [vmem:[#allocation27_spill] sm:$0xff] %v4182_v7 }
  0x9e   : > { %3065 = vmatmul.msk.f32.gmra.mxu2 %vm291_vm1, %v3994_v11  ;;  %3043 = vmatmul.msk.f32.gmra.mxu1 %vm291_vm1, %v241_v15 }
  0x9f   : > { %3133 = vmatmul.msk.f32.gmra.mxu3 %vm291_vm1, %v3815_v35  ;;  %3199 = vmatmul.msk.f32.gmra.mxu0 %vm291_vm1, %v3818_v36 }
  0xa1   : > { %v4008_v19 = vpop.f32.mrf.mxu2 }
  0xa2   : > { %5072 = vst [vmem:[#allocation11_spill] sm:$0xff] %v4008_v19  ;;  %v4010_v20 = vpop.f32.mrf.mxu3 }
  0xa3   : > { %5073 = vst [vmem:[#allocation12_spill] sm:$0xff] %v4010_v20  ;;  %v4015_v23 = vpop.f32.mrf.mxu1 }
  0xa4   : > { %v4020_v25 = vpop.f32.mrf.mxu0 }
  0xa6   : > { %3066 = vmatmul.msk.f32.gmra.mxu2 %vm291_vm1, %v4013_v22  ;;  %3044 = vmatmul.msk.f32.gmra.mxu1 %vm291_vm1, %v4018_v24 }
  0xa7   : > { %3134 = vmatmul.msk.f32.gmra.mxu3 %vm291_vm1, %v3835_v39  ;;  %3200 = vmatmul.msk.f32.gmra.mxu0 %vm291_vm1, %v3838_v40 }
  0xa9   : > { %v4030_v27 = vpop.f32.mrf.mxu2 }
  0xaa   : > { %5074 = vst [vmem:[#allocation13_spill] sm:$0xff] %v4030_v27  ;;  %v4032_v28 = vpop.f32.mrf.mxu3  ;;  %v4138_v27 = vld [vmem:[%s3680_s9 + $0x210] sm:$0xff] }
  0xab   : > { %5075 = vst [vmem:[#allocation14_spill] sm:$0xff] %v4032_v28  ;;  %v4042_v36 = vpop.f32.mrf.mxu1  ;;  %v4100_v28 = vld [vmem:[%s3680_s9 + $0x1f8] sm:$0xff] }
  0xac   : > { %v4040_v35 = vpop.f32.mrf.mxu0 }
  0xae   : > { %3067 = vmatmul.msk.f32.gmra.mxu2 %vm291_vm1, %v4035_v31  ;;  %3045 = vmatmul.msk.f32.gmra.mxu1 %vm291_vm1, %v4038_v32 }
  0xaf   : > { %3135 = vmatmul.msk.f32.gmra.mxu3 %vm291_vm1, %v3863_v45  ;;  %3201 = vmatmul.msk.f32.gmra.mxu0 %vm291_vm1, %v3866_v46 }
  0xb1   : > { %v4052_v39 = vpop.f32.mrf.mxu2 }
  0xb2   : > { %5076 = vst [vmem:[#allocation15_spill] sm:$0xff] %v4052_v39  ;;  %v4054_v40 = vpop.f32.mrf.mxu3 }
  0xb3   : > { %5077 = vst [vmem:[#allocation16_spill] sm:$0xff] %v4054_v40  ;;  %v4070_v45 = vpop.f32.mrf.mxu1  ;;  %v4097_v40 = vld [vmem:[%s3680_s9 + $0x7a] sm:$0xff] }
  0xb4   : > { %v4062_v47 = vpop.f32.mrf.mxu0 }
  0xb6   : > { %3068 = vmatmul.msk.f32.gmra.mxu2 %vm291_vm1, %v4057_v41  ;;  %3046 = vmatmul.msk.f32.gmra.mxu1 %vm291_vm1, %v4060_v42 }
  0xb7   : > { %3136 = vmatmul.msk.f32.gmra.mxu3 %vm291_vm1, %v3887_v50  ;;  %3202 = vmatmul.msk.f32.gmra.mxu0 %vm291_vm1, %v3890_v51 }
  0xb9   : > { %v4074_v46 = vpop.f32.mrf.mxu2 }
  0xba   : > { %5078 = vst [vmem:[#allocation17_spill] sm:$0xff] %v4074_v46  ;;  %v493_v56 = vpop.f32.mrf.mxu3  ;;  %v4120_v46 = vld [vmem:[%s3680_s9 + $0x200] sm:$0xff] }
  0xbb   : > { %v4094_v15 = vpop.f32.mrf.mxu1 }
  0xbc   : > { %v4082_v3 = vpop.f32.mrf.mxu0 }
  0xbe   : > { %3069 = vmatmul.msk.f32.gmra.mxu2 %vm291_vm1, %v4077_v58  ;;  %3047 = vmatmul.msk.f32.gmra.mxu1 %vm291_vm1, %v4080_v59 }
  0xbf   : > { %3137 = vmatmul.msk.f32.gmra.mxu3 %vm291_vm1, %v3907_v54  ;;  %3203 = vmatmul.msk.f32.gmra.mxu0 %vm291_vm1, %v3910_v55 }
  0xc1   : > { %v4092_v50 = vpop.f32.mrf.mxu2 }
  0xc2   : > { %5079 = vst [vmem:[#allocation18_spill] sm:$0xff] %v4092_v50  ;;  %v496_v51 = vpop.f32.mrf.mxu3 }
  0xc3   : > { %v4117_v50 = vpop.f32.mrf.mxu1 }
  0xc4   : > { %v4102_v20 = vpop.f32.mrf.mxu0 }
  0xc6   : > { %3070 = vmatmul.msk.f32.gmra.mxu2 %vm291_vm1, %v4097_v40  ;;  %3048 = vmatmul.msk.f32.gmra.mxu1 %vm291_vm1, %v4100_v28 }
  0xc7   : > { %3138 = vmatmul.msk.f32.gmra.mxu3 %vm291_vm1, %v3922_v57  ;;  %3204 = vmatmul.msk.f32.gmra.mxu0 %vm291_vm1, %v3683_v4 }
  0xc9   : > { %v4112_v54 = vpop.f32.mrf.mxu2 }
  0xca   : > { %5080 = vst [vmem:[#allocation19_spill] sm:$0xff] %v4112_v54  ;;  %v499_v55 = vpop.f32.mrf.mxu3  ;;  %v4135_v54 = vld [vmem:[%s3680_s9 + $0x92] sm:$0xff] }
  0xcb   : > { %v4142_v19 = vpop.f32.mrf.mxu1 }
  0xcc   : > { %v4122_v39 = vpop.f32.mrf.mxu0 }
  0xce   : > { %3071 = vmatmul.msk.f32.gmra.mxu2 %vm291_vm1, %v4115_v10  ;;  %3049 = vmatmul.msk.f32.gmra.mxu1 %vm291_vm1, %v4120_v46 }
  0xcf   : > { %3139 = vmatmul.msk.f32.gmra.mxu3 %vm291_vm1, %v3937_v60  ;;  %3205 = vmatmul.msk.f32.gmra.mxu0 %vm291_vm1, %v3697_v8 }
  0xd1   : > { %v4132_v4 = vpop.f32.mrf.mxu2 }
  0xd2   : > { %5081 = vst [vmem:[#allocation20_spill] sm:$0xff] %v4132_v4  ;;  %v502_v57 = vpop.f32.mrf.mxu3 }
  0xd4   : > { %v4140_v34 = vpop.f32.mrf.mxu0 }
  0xd6   : > { %3072 = vmatmul.msk.f32.gmra.mxu2 %vm291_vm1, %v4135_v54  ;;  %3050 = vmatmul.msk.f32.gmra.mxu1 %vm291_vm1, %v4138_v27 }
  0xd7   : > { %3140 = vmatmul.msk.f32.gmra.mxu3 %vm291_vm1, %v3950_v62  ;;  %3206 = vmatmul.msk.f32.gmra.mxu0 %vm291_vm1, %v3711_v12  ;;  %v4170_v12 = vpop.f32.mrf.mxu1 }
  0xd9   : > { %v4152_v8 = vpop.f32.mrf.mxu2 }
  0xda   : > { %5082 = vst [vmem:[#allocation21_spill] sm:$0xff] %v4152_v8  ;;  %v705_v60 = vpop.f32.mrf.mxu3  ;;  %v4179_v8 = vld [vmem:[%s3680_s9 + $0xaa] sm:$0xff] }
  0xdb   : > { %v4154_v4 = vadd.f32 %v705_v60, %v493_v56  ;;  %5087 = vst [vmem:[#allocation26_spill] sm:$0xff] %v4179_v8 }
  0xdc   : > { %v4162_v62 = vpop.f32.mrf.mxu0 }
  0xdd   : > { %5083 = vst [vmem:[#allocation22_spill] sm:$0xff] %v4154_v4 }
  0xde   : > { %3073 = vmatmul.msk.f32.gmra.mxu2 %vm291_vm1, %v4157_v53  ;;  %3051 = vmatmul.msk.f32.gmra.mxu1 %vm291_vm1, %v4160_v30  ;;  %v4213_v53 = vld [vmem:[%s3680_s9 + $0x230] sm:$0xff] }
  0xdf   : > { %3141 = vmatmul.msk.f32.gmra.mxu3 %vm291_vm1, %v3964_v0  ;;  %3207 = vmatmul.msk.f32.gmra.mxu0 %vm291_vm1, %v3731_v16  ;;  %v4185_v0 = vld [vmem:[%s3680_s9 + $0x228] sm:$0xff] }
  0xe1   : > { %v4174_v56 = vpop.f32.mrf.mxu2 }
  0xe2   : > { %5085 = vst [vmem:[#allocation24_spill] sm:$0xff] %v4174_v56  ;;  %v708_v60 = vpop.f32.mrf.mxu3  ;;  %v4207_v56 = vld [vmem:[%s3680_s9 + $0xb2] sm:$0xff] }
  0xe3   : > { %v4176_v4 = vadd.f32 %v708_v60, %v496_v51  ;;  %v4202_v60 = vpop.f32.mrf.mxu1  ;;  %5092 = vst [vmem:[#allocation31_spill] sm:$0xff] %v4207_v56 }
  0xe4   : > { %v4187_v49 = vpop.f32.mrf.mxu0 }
  0xe5   : > { %5086 = vst [vmem:[#allocation25_spill] sm:$0xff] %v4176_v4 }
  0xe6   : > { %3074 = vmatmul.msk.f32.gmra.mxu2 %vm291_vm1, %v4179_v8  ;;  %3052 = vmatmul.msk.f32.gmra.mxu1 %vm291_vm1, %v4185_v0  ;;  %v4210_v8 = vld [vmem:[%s3680_s9 + $0xc8] sm:$0xff] }
  0xe7   : > { %3142 = vmatmul.msk.f32.gmra.mxu3 %vm291_vm1, %v4182_v7  ;;  %3208 = vmatmul.msk.f32.gmra.mxu0 %vm291_vm1, %v4190_v26  ;;  %5093 = vst [vmem:[#allocation32_spill] sm:$0xff] %v4210_v8  ;;  %v733_v26 = vld [vmem:[%s3680_s9 + $0x1b2] sm:$0xff] }
  0xe9   : > { %v4200_v16 = vpop.f32.mrf.mxu2 }
  0xea   : > { %5090 = vst [vmem:[#allocation29_spill] sm:$0xff] %v4200_v16  ;;  %v711_v51 = vpop.f32.mrf.mxu3 }
  0xeb   : > { %v4204_v4 = vadd.f32 %v711_v51, %v499_v55  ;;  %v4233_v16 = vpop.f32.mrf.mxu1 }
  0xec   : > { %v4215_v7 = vpop.f32.mrf.mxu0 }
  0xed   : > { %5091 = vst [vmem:[#allocation30_spill] sm:$0xff] %v4204_v4 }
  0xee   : > { %5094 = vst [vmem:[#allocation33_spill] sm:$0xff] %v4215_v7  ;;  %3075 = vmatmul.msk.f32.gmra.mxu2 %vm291_vm1, %v4207_v56  ;;  %3053 = vmatmul.msk.f32.gmra.mxu1 %vm291_vm1, %v4213_v53 }
  0xef   : > { %3143 = vmatmul.msk.f32.gmra.mxu3 %vm291_vm1, %v4210_v8  ;;  %3209 = vmatmul.msk.f32.gmra.mxu0 %vm291_vm1, %v4218_v44  ;;  %v622_v44 = vadd.f32 %v3977_v2, %v3980_v6  ;;  %v734_v8 = vld [vmem:[%s3680_s9 + $0x1ba] sm:$0xff]  ;;  %v4259_v6 = vld [vmem:[%s3680_s9 + $0x1ca] sm:$0xff] }
  0xf1   : > { %v4228_v55 = vpop.f32.mrf.mxu2 }
  0xf2   : > { %5096 = vst [vmem:[#allocation35_spill] sm:$0xff] %v4228_v55  ;;  %v714_v51 = vpop.f32.mrf.mxu3 }
  0xf3   : > { %v4230_v4 = vadd.f32 %v714_v51, %v502_v57 }
  0xf4   : > { %v1426_v7 = vpop.f32.mrf.mxu0 }
  0xf5   : > { %5097 = vst [vmem:[#allocation36_spill] sm:$0xff] %v4230_v4 }
  0xf6   : > { %3076 = vmatmul.msk.f32.gmra.mxu2 %vm291_vm1, %v733_v26  ;;  %3260 = vmatmul.msk.f32.vlgmr.msrb.gmra.mxu1 %vm291_vm1, %v3947_v61  ;;  %v4245_v26 = vpop.f32.mrf.mxu1 }
  0xf7   : > { %3144 = vmatmul.msk.f32.gmra.mxu3 %vm291_vm1, %v4018_v24  ;;  %3210 = vmatmul.msk.f32.gmra.mxu0 %vm291_vm1, %v3789_v29  ;;  %v625_v29 = vadd.f32 %v3996_v14, %v3999_v18 }
  0xf9   : > { %v867_v57 = vpop.f32.mrf.mxu2 }
  0xfa   : > { %v1148_v51 = vpop.f32.mrf.mxu3  ;;  %v963_v4 = vadd.f32 %v867_v57, %v622_v44 }
  0xfc   : > { %v1244_v55 = vadd.f32 %v1148_v51, %v963_v4  ;;  %v1429_v56 = vpop.f32.mrf.mxu0 }
  0xfe   : > { %v4247_v21 = vadd.f32 %v1426_v7, %v1244_v55  ;;  %3077 = vmatmul.msk.f32.gmra.mxu2 %vm291_vm1, %v734_v8  ;;  %3261 = vmatmul.msk.f32.gmra.mxu1 %vm291_vm1, %v3961_v63  ;;  %v4271_v63 = vpop.f32.mrf.mxu1  ;;  %v4276_v8 = vld [vmem:[%s3680_s9 + $0x1d2] sm:$0xff] }
  0xff   : > { %3145 = vmatmul.msk.f32.gmra.mxu3 %vm291_vm1, %v4038_v32  ;;  %3211 = vmatmul.msk.f32.gmra.mxu0 %vm291_vm1, %v3809_v33  ;;  %v628_v33 = vadd.f32 %v4015_v23, %v4020_v25 }
 0x101   : > { %v870_v44 = vpop.f32.mrf.mxu2 }
 0x102   : > { %v1151_v61 = vpop.f32.mrf.mxu3  ;;  %v964_v2 = vadd.f32 %v870_v44, %v625_v29  ;;  %v4293_v29 = vld [vmem:[%s3680_s9 + $0x1e2] sm:$0xff] }
 0x104   : > { %v1245_v7 = vadd.f32 %v1151_v61, %v964_v2  ;;  %v1432_v24 = vpop.f32.mrf.mxu0 }
 0x106   : > { %v4261_v4 = vadd.f32 %v1429_v56, %v1245_v7  ;;  %3078 = vmatmul.msk.f32.gmra.mxu2 %vm291_vm1, %v4259_v6  ;;  %3262 = vmatmul.msk.f32.gmra.mxu1 %vm291_vm1, %v3975_v1  ;;  %v4290_v57 = vpop.f32.mrf.mxu1  ;;  %v4308_v7 = vld [vmem:[%s3680_s9 + $0x1ea] sm:$0xff] }
 0x107   : > { %3146 = vmatmul.msk.f32.gmra.mxu3 %vm291_vm1, %v4060_v42  ;;  %3212 = vmatmul.msk.f32.gmra.mxu0 %vm291_vm1, %v3829_v37  ;;  %v631_v37 = vadd.f32 %v4042_v36, %v4040_v35 }
 0x109   : > { %v873_v14 = vpop.f32.mrf.mxu2 }
 0x10a   : > { %v1154_v18 = vpop.f32.mrf.mxu3  ;;  %v965_v32 = vadd.f32 %v873_v14, %v628_v33 }
 0x10c   : > { %v1246_v56 = vadd.f32 %v1154_v18, %v965_v32  ;;  %v1435_v55 = vpop.f32.mrf.mxu0  ;;  %v4325_v32 = vld [vmem:[%s3680_s9 + $0x1fa] sm:$0xff] }
 0x10e   : > { %v4278_v42 = vadd.f32 %v1432_v24, %v1246_v56  ;;  %3079 = vmatmul.msk.f32.gmra.mxu2 %vm291_vm1, %v4276_v8  ;;  %3263 = vmatmul.msk.f32.gmra.mxu1 %vm291_vm1, %v3994_v11  ;;  %v4310_v24 = vpop.f32.mrf.mxu1 }
 0x10f   : > { %3147 = vmatmul.msk.f32.gmra.mxu3 %vm291_vm1, %v4080_v59  ;;  %3213 = vmatmul.msk.f32.gmra.mxu0 %vm291_vm1, %v3857_v43  ;;  %v634_v43 = vadd.f32 %v4070_v45, %v4062_v47 }
 0x111   : > { %v876_v23 = vpop.f32.mrf.mxu2 }
 0x112   : > { %v1157_v25 = vpop.f32.mrf.mxu3  ;;  %v966_v51 = vadd.f32 %v876_v23, %v631_v37 }
 0x114   : > { %v1247_v44 = vadd.f32 %v1157_v25, %v966_v51  ;;  %v1438_v61 = vpop.f32.mrf.mxu0  ;;  %v4342_v25 = vld [vmem:[%s3680_s9 + $0x202] sm:$0xff] }
 0x116   : > { %v4295_v59 = vadd.f32 %v1435_v55, %v1247_v44  ;;  %3080 = vmatmul.msk.f32.gmra.mxu2 %vm291_vm1, %v4293_v29  ;;  %3264 = vmatmul.msk.f32.gmra.mxu1 %vm291_vm1, %v4013_v22  ;;  %v4327_v37 = vpop.f32.mrf.mxu1 }
 0x117   : > { %3148 = vmatmul.msk.f32.gmra.mxu3 %vm291_vm1, %v4100_v28  ;;  %3214 = vmatmul.msk.f32.gmra.mxu0 %vm291_vm1, %v3881_v48  ;;  %v637_v48 = vadd.f32 %v4094_v15, %v4082_v3 }
 0x119   : > { %v879_v35 = vpop.f32.mrf.mxu2 }
 0x11a   : > { %v1160_v36 = vpop.f32.mrf.mxu3  ;;  %v967_v2 = vadd.f32 %v879_v35, %v634_v43  ;;  %v4359_v35 = vld [vmem:[%s3680_s9 + $0x212] sm:$0xff] }
 0x11c   : > { %v1248_v33 = vadd.f32 %v1160_v36, %v967_v2  ;;  %v1441_v14 = vpop.f32.mrf.mxu0 }
 0x11e   : > { %v4312_v28 = vadd.f32 %v1438_v61, %v1248_v33  ;;  %3081 = vmatmul.msk.f32.gmra.mxu2 %vm291_vm1, %v4308_v7  ;;  %3265 = vmatmul.msk.f32.gmra.mxu1 %vm291_vm1, %v4035_v31 }
 0x11f   : > { %3149 = vmatmul.msk.f32.gmra.mxu3 %vm291_vm1, %v4120_v46  ;;  %3215 = vmatmul.msk.f32.gmra.mxu0 %vm291_vm1, %v3901_v52  ;;  %v640_v52 = vadd.f32 %v4117_v50, %v4102_v20  ;;  %v4354_v20 = vpop.f32.mrf.mxu1 }
 0x121   : > { %v882_v47 = vpop.f32.mrf.mxu2 }
 0x122   : > { %v1163_v45 = vpop.f32.mrf.mxu3  ;;  %v968_v18 = vadd.f32 %v882_v47, %v637_v48  ;;  %v4376_v48 = vld [vmem:[%s3680_s9 + $0x21a] sm:$0xff] }
 0x124   : > { %v1249_v56 = vadd.f32 %v1163_v45, %v968_v18  ;;  %v1444_v55 = vpop.f32.mrf.mxu0 }
 0x126   : > { %v4329_v46 = vadd.f32 %v1441_v14, %v1249_v56  ;;  %3082 = vmatmul.msk.f32.gmra.mxu2 %vm291_vm1, %v4325_v32  ;;  %3266 = vmatmul.msk.f32.gmra.mxu1 %vm291_vm1, %v4057_v41  ;;  %v4391_v56 = vld [vmem:[%s3680_s9 + $0x22a] sm:$0xff] }
 0x127   : > { %3150 = vmatmul.msk.f32.gmra.mxu3 %vm291_vm1, %v4138_v27  ;;  %3216 = vmatmul.msk.f32.gmra.mxu0 %vm291_vm1, %v3686_v5  ;;  %v643_v5 = vadd.f32 %v4142_v19, %v4122_v39  ;;  %v4373_v33 = vpop.f32.mrf.mxu1 }
 0x129   : > { %v885_v3 = vpop.f32.mrf.mxu2 }
 0x12a   : > { %v1166_v15 = vpop.f32.mrf.mxu3  ;;  %v969_v23 = vadd.f32 %v885_v3, %v640_v52 }
 0x12c   : > { %v1250_v51 = vadd.f32 %v1166_v15, %v969_v23  ;;  %v1447_v44 = vpop.f32.mrf.mxu0 }
 0x12e   : > { %v4344_v61 = vadd.f32 %v1444_v55, %v1250_v51  ;;  %3083 = vmatmul.msk.f32.gmra.mxu2 %vm291_vm1, %v4342_v25  ;;  %3267 = vmatmul.msk.f32.gmra.mxu1 %vm291_vm1, %v4077_v58  ;;  %v4408_v51 = vld [vmem:[%s3680_s9 + $0x232] sm:$0xff] }
 0x12f   : > { %3151 = vmatmul.msk.f32.gmra.mxu3 %vm291_vm1, %v4160_v30  ;;  %3217 = vmatmul.msk.f32.gmra.mxu0 %vm291_vm1, %v3700_v9  ;;  %v646_v9 = vadd.f32 %v4170_v12, %v4140_v34  ;;  %v4393_v55 = vpop.f32.mrf.mxu1 }
 0x131   : > { %v888_v27 = vpop.f32.mrf.mxu2 }
 0x132   : > { %v1169_v50 = vpop.f32.mrf.mxu3  ;;  %v970_v43 = vadd.f32 %v888_v27, %v643_v5 }
 0x134   : > { %v1251_v36 = vadd.f32 %v1169_v50, %v970_v43  ;;  %v1450_v2 = vpop.f32.mrf.mxu0  ;;  %v5099_v50 = vld [vmem:[#allocation6_spill] sm:$0xff] }
 0x136   : > { %v4361_v30 = vadd.f32 %v1447_v44, %v1251_v36  ;;  %3084 = vmatmul.msk.f32.gmra.mxu2 %vm291_vm1, %v4359_v35  ;;  %3268 = vmatmul.msk.f32.gmra.mxu1 %vm291_vm1, %v4097_v40  ;;  %v5102_v36 = vld [vmem:[#allocation3_spill] sm:$0xff] }
 0x137   : > { %3152 = vmatmul.msk.f32.gmra.mxu3 %vm291_vm1, %v4185_v0  ;;  %3218 = vmatmul.msk.f32.gmra.mxu0 %vm291_vm1, %v3714_v13  ;;  %v649_v13 = vadd.f32 %v4202_v60, %v4162_v62  ;;  %v5098_v62 = vld [vmem:[#allocation2_spill] sm:$0xff]  ;;  %v4410_v27 = vpop.f32.mrf.mxu1 }
 0x139   : > { %v891_v19 = vpop.f32.mrf.mxu2 }
 0x13a   : > { %v1172_v39 = vpop.f32.mrf.mxu3  ;;  %v971_v14 = vadd.f32 %v891_v19, %v646_v9 }
 0x13c   : > { %v1252_v47 = vadd.f32 %v1172_v39, %v971_v14  ;;  %v1453_v45 = vpop.f32.mrf.mxu0  ;;  %v4425_v39 = vld [vmem:[%s3680_s9 + $0x242] sm:$0xff] }
 0x13e   : > { %v4378_v0 = vadd.f32 %v1450_v2, %v1252_v47  ;;  %3085 = vmatmul.msk.f32.gmra.mxu2 %vm291_vm1, %v4376_v48  ;;  %3269 = vmatmul.msk.f32.gmra.mxu1 %vm291_vm1, %v4115_v10 }
 0x13f   : > { %3153 = vmatmul.msk.f32.gmra.mxu3 %vm291_vm1, %v4213_v53  ;;  %3219 = vmatmul.msk.f32.gmra.mxu0 %vm291_vm1, %v3734_v17  ;;  %v652_v17 = vadd.f32 %v4233_v16, %v4187_v49  ;;  %v5100_v49 = vld [vmem:[#allocation23_spill] sm:$0xff]  ;;  %v5101_v16 = vld [vmem:[#allocation33_spill] sm:$0xff] }
 0x140   : > { %v655_v43 = vadd.f32 %v4245_v26, %v5101_v16  ;;  %v5104_v26 = vld [vmem:[#allocation26_spill] sm:$0xff] }
 0x141   : > { %v894_v34 = vpop.f32.mrf.mxu2 }
 0x142   : > { %v1175_v12 = vpop.f32.mrf.mxu3  ;;  %v972_v18 = vadd.f32 %v894_v34, %v649_v13  ;;  %v5103_v13 = vld [vmem:[#allocation7_spill] sm:$0xff]  ;;  %v5105_v34 = vld [vmem:[#allocation9_spill] sm:$0xff] }
 0x144   : > { %v1253_v52 = vadd.f32 %v1175_v12, %v972_v18  ;;  %v1456_v3 = vpop.f32.mrf.mxu0  ;;  %v658_v12 = vadd.f32 %v4271_v63, %v5105_v34  ;;  %v4437_v18 = vpop.f32.mrf.mxu1  ;;  %v5107_v63 = vld [vmem:[#allocation8_spill] sm:$0xff]  ;;  %v4465_v34 = vld [vmem:[%s3680_s9 + $0xc2] sm:$0xff] }
 0x146   : > { %v4395_v53 = vadd.f32 %v1453_v45, %v1253_v52  ;;  %3086 = vmatmul.msk.f32.gmra.mxu2 %vm291_vm1, %v4391_v56  ;;  %3270 = vmatmul.msk.f32.gmra.mxu1 %vm291_vm1, %v4135_v54  ;;  %v5106_v52 = vld [vmem:[#allocation4_spill] sm:$0xff] }
 0x147   : > { %3154 = vmatmul.msk.f32.gmra.mxu3 %vm291_vm1, %v3832_v38  ;;  %3220 = vmatmul.msk.f32.gmra.mxu0 %vm291_vm1, %v5098_v62 }
 0x149   : > { %v897_v60 = vpop.f32.mrf.mxu2 }
 0x14a   : > { %v1178_v15 = vpop.f32.mrf.mxu3  ;;  %v973_v23 = vadd.f32 %v897_v60, %v652_v17  ;;  %v4442_v60 = vld [vmem:[%s3680_s9 + $0x24a] sm:$0xff] }
 0x14c   : > { %v1254_v44 = vadd.f32 %v1178_v15, %v973_v23  ;;  %v1459_v5 = vpop.f32.mrf.mxu0 }
 0x14e   : > { %v4412_v38 = vadd.f32 %v1456_v3, %v1254_v44  ;;  %3087 = vmatmul.msk.f32.gmra.mxu2 %vm291_vm1, %v4408_v51  ;;  %3271 = vmatmul.msk.f32.gmra.mxu1 %vm291_vm1, %v5100_v49 }
 0x14f   : > { %3155 = vmatmul.msk.f32.gmra.mxu3 %vm291_vm1, %v5099_v50  ;;  %3221 = vmatmul.msk.f32.gmra.mxu0 %vm291_vm1, %v5102_v36  ;;  %v5109_v50 = vld [vmem:[#allocation11_spill] sm:$0xff] }
 0x150   : > { %v661_v16 = vadd.f32 %v4290_v57, %v5109_v50  ;;  %v4468_v57 = vld [vmem:[%s3680_s9 + $0x271] sm:$0xff] }
 0x151   : > { %v900_v2 = vpop.f32.mrf.mxu2  ;;  %v4486_v50 = vld [vmem:[%s3680_s9 + $0x278] sm:$0xff] }
 0x152   : > { %v1181_v9 = vpop.f32.mrf.mxu3  ;;  %v974_v19 = vadd.f32 %v900_v2, %v655_v43  ;;  %v5110_v43 = vld [vmem:[#allocation5_spill] sm:$0xff]  ;;  %5113 = vst [vmem:[#allocation6_spill] sm:$0xff] %v4486_v50 }
 0x154   : > { %v1255_v14 = vadd.f32 %v1181_v9, %v974_v19  ;;  %v1462_v47 = vpop.f32.mrf.mxu0  ;;  %v4456_v9 = vpop.f32.mrf.mxu1 }
 0x156   : > { %v4427_v45 = vadd.f32 %v1459_v5, %v1255_v14  ;;  %3088 = vmatmul.msk.f32.gmra.mxu2 %vm291_vm1, %v4425_v39  ;;  %3272 = vmatmul.msk.f32.gmra.mxu1 %vm291_vm1, %v5104_v26  ;;  %v5108_v5 = vld [vmem:[#allocation31_spill] sm:$0xff]  ;;  %v4459_v14 = vld [vmem:[%s3680_s9 + $0x25a] sm:$0xff] }
 0x157   : > { %3156 = vmatmul.msk.f32.gmra.mxu3 %vm291_vm1, %v5103_v13  ;;  %3222 = vmatmul.msk.f32.gmra.mxu0 %vm291_vm1, %v5106_v52 }
 0x159   : > { %v903_v3 = vpop.f32.mrf.mxu2 }
 0x15a   : > { %v1184_v17 = vpop.f32.mrf.mxu3  ;;  %v975_v62 = vadd.f32 %v903_v3, %v658_v12  ;;  %v5112_v3 = vld [vmem:[#allocation13_spill] sm:$0xff] }
 0x15c   : > { %v1256_v15 = vadd.f32 %v1184_v17, %v975_v62  ;;  %v1465_v23 = vpop.f32.mrf.mxu0  ;;  %v664_v17 = vadd.f32 %v4310_v24, %v5112_v3 }
 0x15e   : > { %v4444_v44 = vadd.f32 %v1462_v47, %v1256_v15  ;;  %3089 = vmatmul.msk.f32.gmra.mxu2 %vm291_vm1, %v4442_v60  ;;  %3273 = vmatmul.msk.f32.gmra.mxu1 %vm291_vm1, %v5108_v5  ;;  %v4462_v47 = vld [vmem:[%s3680_s9 + $0x270] sm:$0xff] }
 0x15f   : > { %3157 = vmatmul.msk.f32.gmra.mxu3 %vm291_vm1, %v5107_v63  ;;  %3223 = vmatmul.msk.f32.gmra.mxu0 %vm291_vm1, %v5110_v43 }
 0x161   : > { %v906_v36 = vpop.f32.mrf.mxu2 }
 0x162   : > { %v1187_v2 = vpop.f32.mrf.mxu3  ;;  %v976_v19 = vadd.f32 %v906_v36, %v661_v16  ;;  %v4488_v16 = vpop.f32.mrf.mxu1  ;;  %v4491_v36 = vld [vmem:[%s3680_s9 + $0xca] sm:$0xff] }
 0x164   : > { %v1257_v13 = vadd.f32 %v1187_v2, %v976_v19  ;;  %v1468_v12 = vpop.f32.mrf.mxu0  ;;  %v4494_v19 = vld [vmem:[%s3680_s9 + $0x279] sm:$0xff] }
 0x166   : > { %v4470_v52 = vadd.f32 %v1465_v23, %v1257_v13  ;;  %3090 = vmatmul.msk.f32.gmra.mxu2 %vm291_vm1, %v4459_v14  ;;  %3274 = vmatmul.msk.f32.gmra.mxu1 %vm291_vm1, %v4465_v34  ;;  %v4483_v23 = vld [vmem:[%s3680_s9 + $0x262] sm:$0xff] }
 0x167   : > { %3158 = vmatmul.msk.f32.gmra.mxu3 %vm291_vm1, %v4462_v47  ;;  %3224 = vmatmul.msk.f32.gmra.mxu0 %vm291_vm1, %v4468_v57  ;;  %v5115_v13 = vld [vmem:[#allocation15_spill] sm:$0xff] }
 0x168   : > { %5111 = vst [vmem:[#allocation2_spill] sm:$0xff] %v4470_v52  ;;  %v667_v3 = vadd.f32 %v4327_v37, %v5115_v13  ;;  %v5117_v37 = vld [vmem:[#allocation17_spill] sm:$0xff] }
 0x169   : > { %v909_v62 = vpop.f32.mrf.mxu2  ;;  %v670_v13 = vadd.f32 %v4354_v20, %v5117_v37 }
 0x16a   : > { %v1190_v15 = vpop.f32.mrf.mxu3  ;;  %v977_v63 = vadd.f32 %v909_v62, %v664_v17  ;;  %v4510_v52 = vpop.f32.mrf.mxu1 }
 0x16c   : > { %v1258_v43 = vadd.f32 %v1190_v15, %v977_v63  ;;  %v1471_v2 = vpop.f32.mrf.mxu0  ;;  %v3294_v15 = vld [vmem:[%s3680_s9 + $0x30] sm:$0xff] }
 0x16d   : > { %v3360_v63 = vld [vmem:[%s3680_s9 + $0x31] sm:$0xff] }
 0x16e   : > { %v4496_v24 = vadd.f32 %v1468_v12, %v1258_v43  ;;  %3091 = vmatmul.msk.f32.gmra.mxu2 %vm291_vm1, %v4483_v23  ;;  %3275 = vmatmul.msk.f32.gmra.mxu1 %vm291_vm1, %v4491_v36 }
 0x16f   : > { %3159 = vmatmul.msk.f32.gmra.mxu3 %vm291_vm1, %v4486_v50  ;;  %3225 = vmatmul.msk.f32.gmra.mxu0 %vm291_vm1, %v4494_v19 }
 0x170   : > { %5114 = vst [vmem:[#allocation23_spill] sm:$0xff] %v4496_v24 }
 0x171   : > { %v912_v17 = vpop.f32.mrf.mxu2 }
 0x172   : > { %v1193_v62 = vpop.f32.mrf.mxu3  ;;  %v978_v12 = vadd.f32 %v912_v17, %v667_v3  ;;  %v4532_v20 = vpop.f32.mrf.mxu1 }
 0x174   : > { %v1259_v43 = vadd.f32 %v1193_v62, %v978_v12  ;;  %v1474_v24 = vpop.f32.mrf.mxu0  ;;  %v3361_v12 = vld [vmem:[%s3680_s9 + $0x39] sm:$0xff] }
 0x176   : > { %v4512_v50 = vadd.f32 %v1471_v2, %v1259_v43  ;;  %3328 = vmatmul.msk.f32.vlgmr.msra.gmra.mxu2 %vm291_vm1, %v3294_v15  ;;  %3276 = vmatmul.msk.f32.gmra.mxu1 %vm291_vm1, %v4259_v6  ;;  %v3295_v2 = vld [vmem:[%s3680_s9 + $0x38] sm:$0xff]  ;;  %v5118_v6 = vld [vmem:[#allocation18_spill] sm:$0xff] }
 0x177   : > { %3394 = vmatmul.msk.f32.vlgmr.msrb.gmra.mxu3 %vm291_vm1, %v3360_v63  ;;  %3460 = vmatmul.msk.f32.vlgmr.msra.gmra.mxu0 %vm291_vm1, %v3975_v1  ;;  %v673_v1 = vadd.f32 %v4373_v33, %v5118_v6  ;;  %v3297_v6 = vld [vmem:[%s3680_s9 + $0x50] sm:$0xff] }
 0x178   : > { %5116 = vst [vmem:[#allocation33_spill] sm:$0xff] %v4512_v50 }
 0x179   : > { %v915_v3 = vpop.f32.mrf.mxu2 }
 0x17a   : > { %v1196_v17 = vpop.f32.mrf.mxu3  ;;  %v979_v62 = vadd.f32 %v915_v3, %v670_v13  ;;  %v3296_v13 = vld [vmem:[%s3680_s9 + $0x48] sm:$0xff] }
 0x17b   : > { %v3362_v3 = vld [vmem:[%s3680_s9 + $0x49] sm:$0xff] }
 0x17c   : > { %v1260_v43 = vadd.f32 %v1196_v17, %v979_v62  ;;  %v1477_v15 = vpop.f32.mrf.mxu0 }
 0x17e   : > { %v4524_v50 = vadd.f32 %v1474_v24, %v1260_v43  ;;  %3329 = vmatmul.msk.f32.gmra.mxu2 %vm291_vm1, %v3295_v2  ;;  %3277 = vmatmul.msk.f32.gmra.mxu1 %vm291_vm1, %v4276_v8  ;;  %v5119_v8 = vld [vmem:[#allocation19_spill] sm:$0xff]  ;;  %v4548_v43 = vpop.f32.mrf.mxu1 }
 0x17f   : > { %3395 = vmatmul.msk.f32.gmra.mxu3 %vm291_vm1, %v3361_v12  ;;  %3461 = vmatmul.msk.f32.gmra.mxu0 %vm291_vm1, %v3994_v11  ;;  %v676_v11 = vadd.f32 %v4393_v55, %v5119_v8  ;;  %v3364_v8 = vld [vmem:[%s3680_s9 + $0x61] sm:$0xff] }
 0x181   : > { %v918_v63 = vpop.f32.mrf.mxu2 }
 0x182   : > { %v1199_v37 = vpop.f32.mrf.mxu3  ;;  %v980_v24 = vadd.f32 %v918_v63, %v673_v1  ;;  %v3363_v1 = vld [vmem:[%s3680_s9 + $0x51] sm:$0xff] }
 0x184   : > { %v1261_v17 = vadd.f32 %v1199_v37, %v980_v24  ;;  %v1480_v62 = vpop.f32.mrf.mxu0 }
 0x186   : > { %v4538_v2 = vadd.f32 %v1477_v15, %v1261_v17  ;;  %3330 = vmatmul.msk.f32.gmra.mxu2 %vm291_vm1, %v3296_v13  ;;  %3278 = vmatmul.msk.f32.gmra.mxu1 %vm291_vm1, %v4293_v29 }
 0x187   : > { %3396 = vmatmul.msk.f32.gmra.mxu3 %vm291_vm1, %v3362_v3  ;;  %3462 = vmatmul.msk.f32.gmra.mxu0 %vm291_vm1, %v4013_v22  ;;  %v5120_v22 = vld [vmem:[#allocation20_spill] sm:$0xff] }
 0x188   : > { %v679_v55 = vadd.f32 %v4410_v27, %v5120_v22  ;;  %v3365_v22 = vld [vmem:[%s3680_s9 + $0x69] sm:$0xff] }
 0x189   : > { %v921_v33 = vpop.f32.mrf.mxu2 }
 0x18a   : > { %v1202_v12 = vpop.f32.mrf.mxu3  ;;  %v981_v15 = vadd.f32 %v921_v33, %v676_v11  ;;  %v4564_v11 = vpop.f32.mrf.mxu1 }
 0x18c   : > { %v1262_v63 = vadd.f32 %v1202_v12, %v981_v15  ;;  %v1483_v37 = vpop.f32.mrf.mxu0 }
 0x18e   : > { %v4552_v24 = vadd.f32 %v1480_v62, %v1262_v63  ;;  %3331 = vmatmul.msk.f32.gmra.mxu2 %vm291_vm1, %v3297_v6  ;;  %3279 = vmatmul.msk.f32.gmra.mxu1 %vm291_vm1, %v4308_v7  ;;  %v3298_v62 = vld [vmem:[%s3680_s9 + $0x60] sm:$0xff] }
 0x18f   : > { %3397 = vmatmul.msk.f32.gmra.mxu3 %vm291_vm1, %v3363_v1  ;;  %3463 = vmatmul.msk.f32.gmra.mxu0 %vm291_vm1, %v4035_v31  ;;  %v5121_v31 = vld [vmem:[#allocation21_spill] sm:$0xff] }
 0x190   : > { %v682_v27 = vadd.f32 %v4437_v18, %v5121_v31  ;;  %v3366_v31 = vld [vmem:[%s3680_s9 + $0x79] sm:$0xff] }
 0x191   : > { %v924_v13 = vpop.f32.mrf.mxu2 }
 0x192   : > { %v1205_v3 = vpop.f32.mrf.mxu3  ;;  %v982_v17 = vadd.f32 %v924_v13, %v679_v55 }
 0x194   : > { %v1263_v33 = vadd.f32 %v1205_v3, %v982_v17  ;;  %v1486_v12 = vpop.f32.mrf.mxu0  ;;  %v4578_v3 = vpop.f32.mrf.mxu1 }
 0x196   : > { %v4566_v15 = vadd.f32 %v1483_v37, %v1263_v33  ;;  %3332 = vmatmul.msk.f32.gmra.mxu2 %vm291_vm1, %v3298_v62  ;;  %3280 = vmatmul.msk.f32.gmra.mxu1 %vm291_vm1, %v4325_v32  ;;  %v3299_v37 = vld [vmem:[%s3680_s9 + $0x68] sm:$0xff] }
 0x197   : > { %3398 = vmatmul.msk.f32.gmra.mxu3 %vm291_vm1, %v3364_v8  ;;  %3464 = vmatmul.msk.f32.gmra.mxu0 %vm291_vm1, %v4057_v41  ;;  %v5122_v41 = vld [vmem:[#allocation24_spill] sm:$0xff] }
 0x198   : > { %v685_v18 = vadd.f32 %v4456_v9, %v5122_v41  ;;  %v5123_v9 = vld [vmem:[#allocation29_spill] sm:$0xff]  ;;  %v3367_v41 = vld [vmem:[%s3680_s9 + $0x81] sm:$0xff] }
 0x199   : > { %v927_v6 = vpop.f32.mrf.mxu2 }
 0x19a   : > { %v1208_v1 = vpop.f32.mrf.mxu3  ;;  %v983_v63 = vadd.f32 %v927_v6, %v682_v27 }
 0x19c   : > { %v1264_v55 = vadd.f32 %v1208_v1, %v983_v63  ;;  %v1489_v13 = vpop.f32.mrf.mxu0  ;;  %v4600_v63 = vpop.f32.mrf.mxu1 }
 0x19e   : > { %v4580_v17 = vadd.f32 %v1486_v12, %v1264_v55  ;;  %3333 = vmatmul.msk.f32.gmra.mxu2 %vm291_vm1, %v3299_v37  ;;  %3281 = vmatmul.msk.f32.gmra.mxu1 %vm291_vm1, %v4342_v25  ;;  %v3300_v12 = vld [vmem:[%s3680_s9 + $0x78] sm:$0xff] }
 0x19f   : > { %3399 = vmatmul.msk.f32.gmra.mxu3 %vm291_vm1, %v3365_v22  ;;  %3465 = vmatmul.msk.f32.gmra.mxu0 %vm291_vm1, %v4077_v58  ;;  %v688_v58 = vadd.f32 %v4488_v16, %v5123_v9  ;;  %v5124_v16 = vld [vmem:[#allocation35_spill] sm:$0xff]  ;;  %v3368_v9 = vld [vmem:[%s3680_s9 + $0x91] sm:$0xff] }
 0x1a1   : > { %v930_v62 = vpop.f32.mrf.mxu2 }
 0x1a2   : > { %v1211_v8 = vpop.f32.mrf.mxu3  ;;  %v984_v33 = vadd.f32 %v930_v62, %v685_v18 }
 0x1a4   : > { %v1265_v27 = vadd.f32 %v1211_v8, %v984_v33  ;;  %v1492_v6 = vpop.f32.mrf.mxu0 }
 0x1a6   : > { %v4592_v1 = vadd.f32 %v1489_v13, %v1265_v27  ;;  %3334 = vmatmul.msk.f32.gmra.mxu2 %vm291_vm1, %v3300_v12  ;;  %3282 = vmatmul.msk.f32.gmra.mxu1 %vm291_vm1, %v4359_v35  ;;  %v3301_v13 = vld [vmem:[%s3680_s9 + $0x80] sm:$0xff] }
 0x1a7   : > { %3400 = vmatmul.msk.f32.gmra.mxu3 %vm291_vm1, %v3366_v31  ;;  %3466 = vmatmul.msk.f32.gmra.mxu0 %vm291_vm1, %v4097_v40  ;;  %v691_v40 = vadd.f32 %v4510_v52, %v5124_v16  ;;  %v4616_v31 = vpop.f32.mrf.mxu1 }
 0x1a9   : > { %v933_v37 = vpop.f32.mrf.mxu2 }
 0x1aa   : > { %v1214_v22 = vpop.f32.mrf.mxu3  ;;  %v985_v55 = vadd.f32 %v933_v37, %v688_v58 }
 0x1ac   : > { %v1266_v18 = vadd.f32 %v1214_v22, %v985_v55  ;;  %v1495_v62 = vpop.f32.mrf.mxu0 }
 0x1ae   : > { %v4606_v8 = vadd.f32 %v1492_v6, %v1266_v18  ;;  %3335 = vmatmul.msk.f32.gmra.mxu2 %vm291_vm1, %v3301_v13  ;;  %3283 = vmatmul.msk.f32.gmra.mxu1 %vm291_vm1, %v4376_v48  ;;  %v3302_v6 = vld [vmem:[%s3680_s9 + $0x90] sm:$0xff]  ;;  %v3303_v18 = vld [vmem:[%s3680_s9 + $0x98] sm:$0xff] }
 0x1af   : > { %3401 = vmatmul.msk.f32.gmra.mxu3 %vm291_vm1, %v3367_v41  ;;  %3467 = vmatmul.msk.f32.gmra.mxu0 %vm291_vm1, %v4115_v10  ;;  %v5125_v10 = vld [vmem:[#allocation10_spill] sm:$0xff]  ;;  %v4632_v16 = vpop.f32.mrf.mxu1 }
 0x1b0   : > { %v694_v52 = vadd.f32 %v4532_v20, %v5125_v10 }
 0x1b1   : > { %v936_v33 = vpop.f32.mrf.mxu2 }
 0x1b2   : > { %v1217_v12 = vpop.f32.mrf.mxu3  ;;  %v986_v27 = vadd.f32 %v936_v33, %v691_v40 }
 0x1b4   : > { %v1267_v58 = vadd.f32 %v1217_v12, %v986_v27  ;;  %v1498_v37 = vpop.f32.mrf.mxu0 }
 0x1b6   : > { %v4620_v22 = vadd.f32 %v1495_v62, %v1267_v58  ;;  %3336 = vmatmul.msk.f32.gmra.mxu2 %vm291_vm1, %v3302_v6  ;;  %3284 = vmatmul.msk.f32.gmra.mxu1 %vm291_vm1, %v4391_v56  ;;  %v3369_v62 = vld [vmem:[%s3680_s9 + $0x99] sm:$0xff]  ;;  %v3304_v58 = vld [vmem:[%s3680_s9 + $0xa8] sm:$0xff] }
 0x1b7   : > { %3402 = vmatmul.msk.f32.gmra.mxu3 %vm291_vm1, %v3368_v9  ;;  %3468 = vmatmul.msk.f32.gmra.mxu0 %vm291_vm1, %v4135_v54  ;;  %v5126_v54 = vld [vmem:[#allocation12_spill] sm:$0xff] }
 0x1b8   : > { %v697_v20 = vadd.f32 %v4548_v43, %v5126_v54  ;;  %v3371_v54 = vld [vmem:[%s3680_s9 + $0xb1] sm:$0xff] }
 0x1b9   : > { %v939_v55 = vpop.f32.mrf.mxu2 }
 0x1ba   : > { %v1220_v13 = vpop.f32.mrf.mxu3  ;;  %v987_v41 = vadd.f32 %v939_v55, %v694_v52  ;;  %v4646_v55 = vpop.f32.mrf.mxu1 }
 0x1bc   : > { %v1268_v40 = vadd.f32 %v1220_v13, %v987_v41  ;;  %v1501_v33 = vpop.f32.mrf.mxu0 }
 0x1be   : > { %v4634_v12 = vadd.f32 %v1498_v37, %v1268_v40  ;;  %3337 = vmatmul.msk.f32.gmra.mxu2 %vm291_vm1, %v3303_v18  ;;  %3285 = vmatmul.msk.f32.gmra.mxu1 %vm291_vm1, %v4408_v51  ;;  %v3370_v37 = vld [vmem:[%s3680_s9 + $0xa9] sm:$0xff] }
 0x1bf   : > { %3403 = vmatmul.msk.f32.gmra.mxu3 %vm291_vm1, %v3369_v62  ;;  %3469 = vmatmul.msk.f32.gmra.mxu0 %vm291_vm1, %v5100_v49  ;;  %v5127_v49 = vld [vmem:[#allocation14_spill] sm:$0xff]  ;;  %v3305_v40 = vld [vmem:[%s3680_s9 + $0xb0] sm:$0xff] }
 0x1c0   : > { %v700_v43 = vadd.f32 %v4564_v11, %v5127_v49  ;;  %v5128_v11 = vld [vmem:[#allocation16_spill] sm:$0xff]  ;;  %v2751_v49 = vld [vmem:[%s5042_s2 + $0x8] sm:$0xff] }
 0x1c1   : > { %v942_v27 = vpop.f32.mrf.mxu2  ;;  %2819 = vmatpush.msra.mxu1 %v2751_v49  ;;  %v3308_v49 = vld [vmem:[%s3680_s9 + $0xd8] sm:$0xff] }
 0x1c2   : > { %v1223_v6 = vpop.f32.mrf.mxu3  ;;  %v988_v9 = vadd.f32 %v942_v27, %v697_v20 }
 0x1c4   : > { %v1269_v10 = vadd.f32 %v1223_v6, %v988_v9  ;;  %v1504_v52 = vpop.f32.mrf.mxu0  ;;  %v703_v6 = vadd.f32 %v4578_v3, %v5128_v11  ;;  %v5130_v3 = vld [vmem:[#allocation28_spill] sm:$0xff] }
 0x1c6   : > { %v4648_v13 = vadd.f32 %v1501_v33, %v1269_v10  ;;  %3338 = vmatmul.msk.f32.gmra.mxu2 %vm291_vm1, %v3304_v58  ;;  %3286 = vmatmul.msk.f32.gmra.mxu1 %vm291_vm1, %v4425_v39 }
 0x1c7   : > { %3404 = vmatmul.msk.f32.gmra.mxu3 %vm291_vm1, %v3370_v37  ;;  %3470 = vmatmul.msk.f32.gmra.mxu0 %vm291_vm1, %v5104_v26  ;;  %v4668_v26 = vpop.f32.mrf.mxu1 }
 0x1c9   : > { %v945_v41 = vpop.f32.mrf.mxu2 }
 0x1ca   : > { %v1226_v18 = vpop.f32.mrf.mxu3  ;;  %v989_v62 = vadd.f32 %v945_v41, %v700_v43  ;;  %v5129_v41 = vld [vmem:[#allocation27_spill] sm:$0xff] }
 0x1cc   : > { %v1270_v33 = vadd.f32 %v1226_v18, %v989_v62  ;;  %v1507_v20 = vpop.f32.mrf.mxu0  ;;  %v5131_v62 = vld [vmem:[#allocation22_spill] sm:$0xff] }
 0x1ce   : > { %v4660_v27 = vadd.f32 %v1504_v52, %v1270_v33  ;;  %3339 = vmatmul.msk.f32.gmra.mxu2 %vm291_vm1, %v3305_v40  ;;  %3287 = vmatmul.msk.f32.gmra.mxu1 %vm291_vm1, %v4442_v60 }
 0x1cf   : > { %3405 = vmatmul.msk.f32.gmra.mxu3 %vm291_vm1, %v3371_v54  ;;  %3471 = vmatmul.msk.f32.gmra.mxu0 %vm291_vm1, %v5108_v5  ;;  %v4686_v54 = vpop.f32.mrf.mxu1 }
 0x1d1   : > { %v948_v9 = vpop.f32.mrf.mxu2 }
 0x1d2   : > { %v1229_v58 = vpop.f32.mrf.mxu3  ;;  %v990_v37 = vadd.f32 %v948_v9, %v703_v6  ;;  %v5132_v6 = vld [vmem:[#allocation32_spill] sm:$0xff]  ;;  %v5133_v9 = vld [vmem:[#allocation34_spill] sm:$0xff] }
 0x1d4   : > { %v1271_v10 = vadd.f32 %v1229_v58, %v990_v37  ;;  %v1510_v52 = vpop.f32.mrf.mxu0  ;;  %v5134_v37 = vld [vmem:[#allocation25_spill] sm:$0xff] }
 0x1d6   : > { %v4675_v43 = vadd.f32 %v1507_v20, %v1271_v10  ;;  %3340 = vmatmul.msk.f32.gmra.mxu2 %vm291_vm1, %v5129_v41  ;;  %3288 = vmatmul.msk.f32.gmra.mxu1 %vm291_vm1, %v4459_v14 }
 0x1d7   : > { %3406 = vmatmul.msk.f32.gmra.mxu3 %vm291_vm1, %v5130_v3  ;;  %3472 = vmatmul.msk.f32.gmra.mxu0 %vm291_vm1, %v4465_v34  ;;  %v4702_v3 = vld [vmem:[%s3680_s9 + $0x272] sm:$0xff] }
 0x1d9   : > { %v951_v5 = vpop.f32.mrf.mxu2 }
 0x1da   : > { %v1232_v18 = vpop.f32.mrf.mxu3  ;;  %v991_v40 = vadd.f32 %v951_v5, %v5131_v62  ;;  %v4704_v5 = vpop.f32.mrf.mxu1  ;;  %v3440_v62 = vld [vmem:[%s3680_s9 + $0xda] sm:$0xff] }
 0x1dc   : > { %v1272_v33 = vadd.f32 %v1232_v18, %v991_v40  ;;  %v1513_v20 = vpop.f32.mrf.mxu0 }
 0x1de   : > { %v4688_v11 = vadd.f32 %v1510_v52, %v1272_v33  ;;  %3341 = vmatmul.msk.f32.gmra.mxu2 %vm291_vm1, %v5132_v6  ;;  %3289 = vmatmul.msk.f32.gmra.mxu1 %vm291_vm1, %v4483_v23  ;;  %v3374_v52 = vld [vmem:[%s3680_s9 + $0xd9] sm:$0xff] }
 0x1df   : > { %3407 = vmatmul.msk.f32.gmra.mxu3 %vm291_vm1, %v5133_v9  ;;  %3473 = vmatmul.msk.f32.gmra.mxu0 %vm291_vm1, %v4491_v36  ;;  %v5136_v6 = vld [vmem:[#allocation30_spill] sm:$0xff] }
 0x1e1   : > { %v954_v34 = vpop.f32.mrf.mxu2 }
 0x1e2   : > { %v1235_v58 = vpop.f32.mrf.mxu3  ;;  %v992_v10 = vadd.f32 %v954_v34, %v5134_v37  ;;  %v3309_v34 = vld [vmem:[%s3680_s9 + $0xe0] sm:$0xff] }
 0x1e4   : > { %v1273_v41 = vadd.f32 %v1235_v58, %v992_v10  ;;  %v1516_v18 = vpop.f32.mrf.mxu0  ;;  %v3375_v58 = vld [vmem:[%s3680_s9 + $0xe1] sm:$0xff] }
 0x1e6   : > { %v4707_v40 = vadd.f32 %v1513_v20, %v1273_v41  ;;  %3342 = vmatmul.msk.f32.gmra.mxu2 %vm291_vm1, %v3308_v49  ;;  %3290 = vmatmul.msk.f32.gmra.mxu1 %vm291_vm1, %v4702_v3  ;;  %v4718_v20 = vld [vmem:[%s3680_s9 + $0x27a] sm:$0xff]  ;;  %v3441_v49 = vld [vmem:[%s3680_s9 + $0xe2] sm:$0xff] }
 0x1e7   : > { %3408 = vmatmul.msk.f32.gmra.mxu3 %vm291_vm1, %v3374_v52  ;;  %3474 = vmatmul.msk.f32.gmra.mxu0 %vm291_vm1, %v3440_v62  ;;  %v4725_v52 = vpop.f32.mrf.mxu1 }
 0x1e8   : > { %5135 = vst [vmem:[#allocation3_spill] sm:$0xff] %v4707_v40  ;;  %v3311_v40 = vld [vmem:[%s3680_s9 + $0x1e8] sm:$0xff] }
 0x1e9   : > { %v957_v36 = vpop.f32.mrf.mxu2 }
 0x1ea   : > { %v1238_v33 = vpop.f32.mrf.mxu3  ;;  %v993_v9 = vadd.f32 %v957_v36, %v5136_v6 }
 0x1ec   : > { %v1274_v37 = vadd.f32 %v1238_v33, %v993_v9  ;;  %v1519_v10 = vpop.f32.mrf.mxu0  ;;  %v5138_v33 = vld [vmem:[#allocation36_spill] sm:$0xff]  ;;  %v3310_v9 = vld [vmem:[%s3680_s9 + $0x1e0] sm:$0xff] }
 0x1ee   : > { %v4721_v41 = vadd.f32 %v1516_v18, %v1274_v37  ;;  %3343 = vmatmul.msk.f32.gmra.mxu2 %vm291_vm1, %v3309_v34  ;;  %3291 = vmatmul.msk.f32.gmra.mxu1 %vm291_vm1, %v4718_v20  ;;  %v3376_v18 = vld [vmem:[%s3680_s9 + $0x1e1] sm:$0xff] }
 0x1ef   : > { %3409 = vmatmul.msk.f32.gmra.mxu3 %vm291_vm1, %v3375_v58  ;;  %3475 = vmatmul.msk.f32.gmra.mxu0 %vm291_vm1, %v3441_v49  ;;  %v1800_v58 = vadd.f32 %v4600_v63, %v4247_v21  ;;  %v1801_v21 = vadd.f32 %v4616_v31, %v4261_v4  ;;  %v1802_v4 = vadd.f32 %v4632_v16, %v4278_v42 }
 0x1f0   : > { %5137 = vst [vmem:[#allocation7_spill] sm:$0xff] %v4721_v41  ;;  %v1803_v42 = vadd.f32 %v4646_v55, %v4295_v59  ;;  %v1804_v59 = vadd.f32 %v4668_v26, %v4312_v28  ;;  %v1805_v28 = vadd.f32 %v4686_v54, %v4329_v46  ;;  %v1806_v46 = vadd.f32 %v4704_v5, %v4344_v61 }
 0x1f1   : > { %v960_v62 = vpop.f32.mrf.mxu2  ;;  %v1807_v61 = vadd.f32 %v4725_v52, %v4361_v30 }
 0x1f2   : > { %v1241_v36 = vpop.f32.mrf.mxu3  ;;  %v994_v6 = vadd.f32 %v960_v62, %v5138_v33 }
 0x1f4   : > { %v1275_v37 = vadd.f32 %v1241_v36, %v994_v6  ;;  %v2541_v41 = vpop.f32.mrf.mxu0  ;;  %v3377_v36 = vld [vmem:[%s3680_s9 + $0x1e9] sm:$0xff] }
 0x1f6   : > { %v4733_v34 = vadd.f32 %v1519_v10, %v1275_v37  ;;  %3344 = vmatmul.msk.f32.gmra.mxu2 %vm291_vm1, %v3310_v9 }
 0x1f7   : > { %3410 = vmatmul.msk.f32.gmra.mxu3 %vm291_vm1, %v3376_v18  ;;  %3476 = vmatmul.msk.f32.gmra.mxu0 %vm291_vm1, %v4293_v29  ;;  %v3312_v18 = vld [vmem:[%s3680_s9 + $0x1f8] sm:$0xff] }
 0x1f9   : > { %v1985_v49 = vpop.f32.mrf.mxu2 }
 0x1fa   : > { %v2263_v62 = vpop.f32.mrf.mxu3  ;;  %v2081_v33 = vadd.f32 %v1985_v49, %v1800_v58  ;;  %v3378_v58 = vld [vmem:[%s3680_s9 + $0x1f9] sm:$0xff] }
 0x1fc   : > { %v2359_v6 = vadd.f32 %v2263_v62, %v2081_v33  ;;  %v2544_v10 = vpop.f32.mrf.mxu0  ;;  %v4753_v62 = vpop.f32.mrf.mxu1 }
 0x1fd   : > { %v1808_v30 = vadd.f32 %v4753_v62, %v4378_v0 }
 0x1fe   : > { %v4743_v37 = vadd.f32 %v2541_v41, %v2359_v6  ;;  %3345 = vmatmul.msk.f32.gmra.mxu2 %vm291_vm1, %v3311_v40  ;;  %v3379_v6 = vld [vmem:[%s3680_s9 + $0x201] sm:$0xff] }
 0x1ff   : > { %3411 = vmatmul.msk.f32.gmra.mxu3 %vm291_vm1, %v3377_v36  ;;  %3477 = vmatmul.msk.f32.gmra.mxu0 %vm291_vm1, %v4308_v7  ;;  %v3313_v36 = vld [vmem:[%s3680_s9 + $0x200] sm:$0xff] }
 0x201   : > { %v1988_v29 = vpop.f32.mrf.mxu2 }
 0x202   : > { %v2266_v63 = vpop.f32.mrf.mxu3  ;;  %v2082_v9 = vadd.f32 %v1988_v29, %v1801_v21 }
 0x204   : > { %v2360_v49 = vadd.f32 %v2266_v63, %v2082_v9  ;;  %v2547_v41 = vpop.f32.mrf.mxu0  ;;  %v4771_v16 = vpop.f32.mrf.mxu1 }
 0x205   : > { %v1809_v0 = vadd.f32 %v4771_v16, %v4395_v53 }
 0x206   : > { %v4755_v40 = vadd.f32 %v2544_v10, %v2360_v49  ;;  %3346 = vmatmul.msk.f32.gmra.mxu2 %vm291_vm1, %v3312_v18  ;;  %v3314_v18 = vld [vmem:[%s3680_s9 + $0x210] sm:$0xff] }
 0x207   : > { %3412 = vmatmul.msk.f32.gmra.mxu3 %vm291_vm1, %v3378_v58  ;;  %3478 = vmatmul.msk.f32.gmra.mxu0 %vm291_vm1, %v4325_v32  ;;  %v3380_v58 = vld [vmem:[%s3680_s9 + $0x211] sm:$0xff] }
 0x209   : > { %v1991_v7 = vpop.f32.mrf.mxu2 }
 0x20a   : > { %v2269_v31 = vpop.f32.mrf.mxu3  ;;  %v2083_v33 = vadd.f32 %v1991_v7, %v1802_v4 }
 0x20c   : > { %v2361_v21 = vadd.f32 %v2269_v31, %v2083_v33  ;;  %v2550_v10 = vpop.f32.mrf.mxu0  ;;  %v4785_v7 = vpop.f32.mrf.mxu1  ;;  %v3315_v33 = vld [vmem:[%s3680_s9 + $0x218] sm:$0xff] }
 0x20d   : > { %v1810_v53 = vadd.f32 %v4785_v7, %v4412_v38 }
 0x20e   : > { %v4765_v29 = vadd.f32 %v2547_v41, %v2361_v21  ;;  %3347 = vmatmul.msk.f32.gmra.mxu2 %vm291_vm1, %v3313_v36  ;;  %v3381_v36 = vld [vmem:[%s3680_s9 + $0x219] sm:$0xff] }
 0x20f   : > { %3413 = vmatmul.msk.f32.gmra.mxu3 %vm291_vm1, %v3379_v6  ;;  %3479 = vmatmul.msk.f32.gmra.mxu0 %vm291_vm1, %v4342_v25 }
 0x211   : > { %v1994_v32 = vpop.f32.mrf.mxu2 }
 0x212   : > { %v2272_v63 = vpop.f32.mrf.mxu3  ;;  %v2084_v9 = vadd.f32 %v1994_v32, %v1803_v42  ;;  %v3316_v32 = vld [vmem:[%s3680_s9 + $0x228] sm:$0xff] }
 0x214   : > { %v2362_v49 = vadd.f32 %v2272_v63, %v2084_v9  ;;  %v2553_v41 = vpop.f32.mrf.mxu0  ;;  %v3382_v63 = vld [vmem:[%s3680_s9 + $0x229] sm:$0xff]  ;;  %v4799_v9 = vpop.f32.mrf.mxu1 }
 0x215   : > { %v1811_v38 = vadd.f32 %v4799_v9, %v4427_v45 }
 0x216   : > { %v4777_v4 = vadd.f32 %v2550_v10, %v2362_v49  ;;  %3348 = vmatmul.msk.f32.gmra.mxu2 %vm291_vm1, %v3314_v18 }
 0x217   : > { %3414 = vmatmul.msk.f32.gmra.mxu3 %vm291_vm1, %v3380_v58  ;;  %3480 = vmatmul.msk.f32.gmra.mxu0 %vm291_vm1, %v4359_v35 }
 0x219   : > { %v1997_v25 = vpop.f32.mrf.mxu2 }
 0x21a   : > { %v2275_v55 = vpop.f32.mrf.mxu3  ;;  %v2085_v31 = vadd.f32 %v1997_v25, %v1804_v59  ;;  %v3317_v59 = vld [vmem:[%s3680_s9 + $0x230] sm:$0xff] }
 0x21b   : > { %v3383_v25 = vld [vmem:[%s3680_s9 + $0x231] sm:$0xff] }
 0x21c   : > { %v2363_v6 = vadd.f32 %v2275_v55, %v2085_v31  ;;  %v2556_v21 = vpop.f32.mrf.mxu0 }
 0x21e   : > { %v4789_v10 = vadd.f32 %v2553_v41, %v2363_v6  ;;  %3349 = vmatmul.msk.f32.gmra.mxu2 %vm291_vm1, %v3315_v33  ;;  %v4811_v33 = vpop.f32.mrf.mxu1 }
 0x21f   : > { %3415 = vmatmul.msk.f32.gmra.mxu3 %vm291_vm1, %v3381_v36  ;;  %3481 = vmatmul.msk.f32.gmra.mxu0 %vm291_vm1, %v4376_v48  ;;  %v1812_v45 = vadd.f32 %v4811_v33, %v4444_v44  ;;  %v5140_v44 = vld [vmem:[#allocation2_spill] sm:$0xff] }
 0x221   : > { %v2000_v35 = vpop.f32.mrf.mxu2 }
 0x222   : > { %v2278_v26 = vpop.f32.mrf.mxu3  ;;  %v2086_v42 = vadd.f32 %v2000_v35, %v1805_v28  ;;  %v3384_v28 = vld [vmem:[%s3680_s9 + $0x241] sm:$0xff] }
 0x224   : > { %v2364_v18 = vadd.f32 %v2278_v26, %v2086_v42  ;;  %v2559_v58 = vpop.f32.mrf.mxu0 }
 0x226   : > { %v4801_v49 = vadd.f32 %v2556_v21, %v2364_v18  ;;  %3350 = vmatmul.msk.f32.gmra.mxu2 %vm291_vm1, %v3316_v32  ;;  %v3318_v21 = vld [vmem:[%s3680_s9 + $0x240] sm:$0xff]  ;;  %v1743_v52 = vpop.f32.mrf.mxu1  ;;  %v3319_v18 = vld [vmem:[%s3680_s9 + $0x248] sm:$0xff] }
 0x227   : > { %3416 = vmatmul.msk.f32.gmra.mxu3 %vm291_vm1, %v3382_v63  ;;  %3482 = vmatmul.msk.f32.gmra.mxu0 %vm291_vm1, %v4391_v56 }
 0x229   : > { %v2003_v48 = vpop.f32.mrf.mxu2 }
 0x22a   : > { %v2281_v54 = vpop.f32.mrf.mxu3  ;;  %v2087_v41 = vadd.f32 %v2003_v48, %v1806_v46 }
 0x22c   : > { %v2365_v55 = vadd.f32 %v2281_v54, %v2087_v41  ;;  %v2562_v31 = vpop.f32.mrf.mxu0 }
 0x22e   : > { %v4813_v36 = vadd.f32 %v2559_v58, %v2365_v55  ;;  %3351 = vmatmul.msk.f32.gmra.mxu2 %vm291_vm1, %v3317_v59  ;;  %v3385_v58 = vld [vmem:[%s3680_s9 + $0x249] sm:$0xff]  ;;  %v1746_v41 = vpop.f32.mrf.mxu1  ;;  %v3386_v55 = vld [vmem:[%s3680_s9 + $0x259] sm:$0xff] }
 0x22f   : > { %3417 = vmatmul.msk.f32.gmra.mxu3 %vm291_vm1, %v3383_v25  ;;  %3483 = vmatmul.msk.f32.gmra.mxu0 %vm291_vm1, %v4408_v51  ;;  %v3320_v25 = vld [vmem:[%s3680_s9 + $0x258] sm:$0xff] }
 0x231   : > { %v2006_v56 = vpop.f32.mrf.mxu2 }
 0x232   : > { %v2284_v5 = vpop.f32.mrf.mxu3  ;;  %v2088_v6 = vadd.f32 %v2006_v56, %v1807_v61 }
 0x234   : > { %v2366_v35 = vadd.f32 %v2284_v5, %v2088_v6  ;;  %v2565_v26 = vpop.f32.mrf.mxu0  ;;  %v3321_v6 = vld [vmem:[%s3680_s9 + $0x260] sm:$0xff] }
 0x236   : > { %v4823_v42 = vadd.f32 %v2562_v31, %v2366_v35  ;;  %3352 = vmatmul.msk.f32.gmra.mxu2 %vm291_vm1, %v3318_v21  ;;  %v3387_v21 = vld [vmem:[%s3680_s9 + $0x261] sm:$0xff] }
 0x237   : > { %3418 = vmatmul.msk.f32.gmra.mxu3 %vm291_vm1, %v3384_v28  ;;  %3484 = vmatmul.msk.f32.gmra.mxu0 %vm291_vm1, %v4425_v39  ;;  %v1749_v28 = vpop.f32.mrf.mxu1 }
 0x239   : > { %v2009_v51 = vpop.f32.mrf.mxu2 }
 0x23a   : > { %v2287_v32 = vpop.f32.mrf.mxu3  ;;  %v2089_v63 = vadd.f32 %v2009_v51, %v1808_v30 }
 0x23c   : > { %v2367_v46 = vadd.f32 %v2287_v32, %v2089_v63  ;;  %v2568_v48 = vpop.f32.mrf.mxu0  ;;  %v2750_v63 = vld [vmem:[%s5042_s2] sm:$0xff] }
 0x23d   : > { %2820 = vmatpush.msra.mxu1 %v2750_v63 }
 0x23e   : > { %v4833_v54 = vadd.f32 %v2565_v26, %v2367_v46  ;;  %3353 = vmatmul.msk.f32.gmra.mxu2 %vm291_vm1, %v3319_v18 }
 0x23f   : > { %3419 = vmatmul.msk.f32.gmra.mxu3 %vm291_vm1, %v3385_v58  ;;  %3485 = vmatmul.msk.f32.gmra.mxu0 %vm291_vm1, %v4442_v60  ;;  %v1752_v58 = vpop.f32.mrf.mxu1 }
 0x241   : > { %v2012_v39 = vpop.f32.mrf.mxu2 }
 0x242   : > { %v2290_v62 = vpop.f32.mrf.mxu3  ;;  %v2090_v59 = vadd.f32 %v2012_v39, %v1809_v0 }
 0x244   : > { %v2368_v31 = vadd.f32 %v2290_v62, %v2090_v59  ;;  %v2571_v61 = vpop.f32.mrf.mxu0 }
 0x246   : > { %v4843_v56 = vadd.f32 %v2568_v48, %v2368_v31  ;;  %3354 = vmatmul.msk.f32.gmra.mxu2 %vm291_vm1, %v3320_v25  ;;  %v3390_v31 = vld [vmem:[%s3680_s9 + $0x289] sm:$0xff] }
 0x247   : > { %3420 = vmatmul.msk.f32.gmra.mxu3 %vm291_vm1, %v3386_v55  ;;  %3486 = vmatmul.msk.f32.gmra.mxu0 %vm291_vm1, %v4459_v14  ;;  %v1755_v33 = vpop.f32.mrf.mxu1  ;;  %v3324_v55 = vld [vmem:[%s3680_s9 + $0x288] sm:$0xff] }
 0x249   : > { %v2015_v60 = vpop.f32.mrf.mxu2 }
 0x24a   : > { %v2293_v16 = vpop.f32.mrf.mxu3  ;;  %v2091_v5 = vadd.f32 %v2015_v60, %v1810_v53  ;;  %v3456_v60 = vld [vmem:[%s3680_s9 + $0x28a] sm:$0xff] }
 0x24c   : > { %v2369_v35 = vadd.f32 %v2293_v16, %v2091_v5  ;;  %v2574_v26 = vpop.f32.mrf.mxu0 }
 0x24e   : > { %v4853_v30 = vadd.f32 %v2571_v61, %v2369_v35  ;;  %3355 = vmatmul.msk.f32.gmra.mxu2 %vm291_vm1, %v3321_v6  ;;  %v3325_v35 = vld [vmem:[%s3680_s9 + $0x290] sm:$0xff] }
 0x24f   : > { %3421 = vmatmul.msk.f32.gmra.mxu3 %vm291_vm1, %v3387_v21  ;;  %3487 = vmatmul.msk.f32.gmra.mxu0 %vm291_vm1, %v4483_v23  ;;  %v1758_v6 = vpop.f32.mrf.mxu1 }
 0x251   : > { %v2018_v14 = vpop.f32.mrf.mxu2 }
 0x252   : > { %v2296_v7 = vpop.f32.mrf.mxu3  ;;  %v2092_v51 = vadd.f32 %v2018_v14, %v1811_v38 }
 0x254   : > { %v2370_v32 = vadd.f32 %v2296_v7, %v2092_v51  ;;  %v2577_v18 = vpop.f32.mrf.mxu0  ;;  %v3457_v7 = vld [vmem:[%s3680_s9 + $0x292] sm:$0xff] }
 0x256   : > { %v4864_v46 = vadd.f32 %v2574_v26, %v2370_v32  ;;  %3356 = vmatmul.msk.f32.gmra.mxu2 %vm291_vm1, %v4462_v47  ;;  %v5139_v47 = vld [vmem:[#allocation6_spill] sm:$0xff]  ;;  %v3391_v26 = vld [vmem:[%s3680_s9 + $0x291] sm:$0xff]  ;;  %s2988_s9 = sshll.u32 %s217_s8, 3 }
 0x257   : > { %3422 = vmatmul.msk.f32.gmra.mxu3 %vm291_vm1, %v4468_v57  ;;  %3488 = vmatmul.msk.f32.gmra.mxu0 %vm291_vm1, %v4702_v3  ;;  %v1813_v57 = vadd.f32 %v1743_v52, %v5140_v44  ;;  %v5142_v32 = vld [vmem:[#allocation33_spill] sm:$0xff]  ;;  %s4991_s13 = scalar_lea.vmem %s5044_s4, %s2988_s9 }
 0x258   : > { %v1815_v63 = vadd.f32 %v1749_v28, %v5142_v32  ;;  %v1817_v28 = vadd.f32 %v1755_v33, %v4538_v2 }
 0x259   : > { %v2021_v23 = vpop.f32.mrf.mxu2 }
 0x25a   : > { %v2299_v9 = vpop.f32.mrf.mxu3  ;;  %v2093_v48 = vadd.f32 %v2021_v23, %v1812_v45  ;;  %v1761_v23 = vpop.f32.mrf.mxu1 }
 0x25b   : > { %v1819_v33 = vadd.f32 %v1761_v23, %v4566_v15 }
 0x25c   : > { %v2371_v0 = vadd.f32 %v2299_v9, %v2093_v48  ;;  %v2580_v39 = vpop.f32.mrf.mxu0 }
 0x25e   : > { %v4874_v62 = vadd.f32 %v2577_v18, %v2371_v0  ;;  %3357 = vmatmul.msk.f32.gmra.mxu2 %vm291_vm1, %v5139_v47 }
 0x25f   : > { %3423 = vmatmul.msk.f32.gmra.mxu3 %vm291_vm1, %v4494_v19  ;;  %3489 = vmatmul.msk.f32.gmra.mxu0 %vm291_vm1, %v4718_v20  ;;  %v5141_v19 = vld [vmem:[#allocation23_spill] sm:$0xff] }
 0x260   : > { %v1814_v52 = vadd.f32 %v1746_v41, %v5141_v19 }
 0x261   : > { %v2024_v3 = vpop.f32.mrf.mxu2 }
 0x262   : > { %v2302_v59 = vpop.f32.mrf.mxu3  ;;  %v2094_v25 = vadd.f32 %v2024_v3, %v1813_v57 }
 0x264   : > { %v2372_v61 = vadd.f32 %v2302_v59, %v2094_v25  ;;  %v2583_v53 = vpop.f32.mrf.mxu0  ;;  %v1764_v25 = vpop.f32.mrf.mxu1 }
 0x266   : > { %v4886_v16 = vadd.f32 %v2580_v39, %v2372_v61  ;;  %3358 = vmatmul.msk.f32.gmra.mxu2 %vm291_vm1, %v3324_v55  ;;  %v1816_v39 = vadd.f32 %v1752_v58, %v4524_v50  ;;  %v1818_v50 = vadd.f32 %v1758_v6, %v4552_v24  ;;  %v1820_v6 = vadd.f32 %v1764_v25, %v4580_v17 }
 0x267   : > { %3424 = vmatmul.msk.f32.gmra.mxu3 %vm291_vm1, %v3390_v31  ;;  %3490 = vmatmul.msk.f32.gmra.mxu0 %vm291_vm1, %v3456_v60 }
 0x269   : > { %v2027_v20 = vpop.f32.mrf.mxu2 }
 0x26a   : > { %v2305_v5 = vpop.f32.mrf.mxu3  ;;  %v2095_v21 = vadd.f32 %v2027_v20, %v1814_v52 }
 0x26c   : > { %v2373_v38 = vadd.f32 %v2305_v5, %v2095_v21  ;;  %v2586_v14 = vpop.f32.mrf.mxu0  ;;  %v1767_v58 = vpop.f32.mrf.mxu1 }
 0x26d   : > { %v1821_v23 = vadd.f32 %v1767_v58, %v4592_v1 }
 0x26e   : > { %v4895_v51 = vadd.f32 %v2583_v53, %v2373_v38  ;;  %3359 = vmatmul.msk.f32.gmra.mxu2 %vm291_vm1, %v3325_v35 }
 0x26f   : > { %3425 = vmatmul.msk.f32.gmra.mxu3 %vm291_vm1, %v3391_v26  ;;  %3491 = vmatmul.msk.f32.gmra.mxu0 %vm291_vm1, %v3457_v7 }
 0x271   : > { %v2030_v41 = vpop.f32.mrf.mxu2 }
 0x272   : > { %v2308_v18 = vpop.f32.mrf.mxu3  ;;  %v2096_v45 = vadd.f32 %v2030_v41, %v1815_v63 }
 0x274   : > { %v2374_v9 = vadd.f32 %v2308_v18, %v2096_v45  ;;  %v2589_v48 = vpop.f32.mrf.mxu0  ;;  %v1770_v7 = vpop.f32.mrf.mxu1 }
 0x275   : > { %v1822_v25 = vadd.f32 %v1770_v7, %v4606_v8 }
 0x276   : > { %v4901_v0 = vadd.f32 %v2586_v14, %v2374_v9 }
 0x279   : > { %v2033_v47 = vpop.f32.mrf.mxu2 }
 0x27a   : > { %v2311_v44 = vpop.f32.mrf.mxu3  ;;  %v2097_v57 = vadd.f32 %v2033_v47, %v1816_v39 }
 0x27c   : > { %v2375_v3 = vadd.f32 %v2311_v44, %v2097_v57  ;;  %v2592_v59 = vpop.f32.mrf.mxu0 }
 0x27e   : > { %v2653_v55 = vadd.f32 %v2589_v48, %v2375_v3  ;;  %v1773_v48 = vpop.f32.mrf.mxu1 }
 0x27f   : > { %v1823_v1 = vadd.f32 %v1773_v48, %v4620_v22 }
 0x280   : > { %2685 = vrot.lane.b32.xlu0 %v2653_v55, %s3596_s5 }
 0x281   : > { %v2036_v31 = vpop.f32.mrf.mxu2 }
 0x282   : > { %v2314_v61 = vpop.f32.mrf.mxu3  ;;  %v2098_v53 = vadd.f32 %v2036_v31, %v1817_v28 }
 0x284   : > { %v2376_v60 = vadd.f32 %v2314_v61, %v2098_v53  ;;  %v2595_v19 = vpop.f32.mrf.mxu0 }
 0x286   : > { %v2654_v52 = vadd.f32 %v2592_v59, %v2376_v60  ;;  %v1776_v28 = vpop.f32.mrf.mxu1 }
 0x287   : > { %v1824_v8 = vadd.f32 %v1776_v28, %v4634_v12 }
 0x288   : > { %2687 = vrot.lane.b32.xlu0 %v2654_v52, %s3596_s5 }
 0x289   : > { %v2039_v20 = vpop.f32.mrf.mxu2 }
 0x28a   : > { %v2317_v5 = vpop.f32.mrf.mxu3  ;;  %v2099_v21 = vadd.f32 %v2039_v20, %v1818_v50 }
 0x28c   : > { %v2377_v35 = vadd.f32 %v2317_v5, %v2099_v21  ;;  %v2598_v26 = vpop.f32.mrf.mxu0 }
 0x28e   : > { %v2655_v2 = vadd.f32 %v2595_v19, %v2377_v35  ;;  %v1779_v50 = vpop.f32.mrf.mxu1 }
 0x290   : > { %2689 = vrot.lane.b32.xlu1 %v2655_v2, %s3596_s5 }
 0x291   : > { %v2042_v38 = vpop.f32.mrf.mxu2 }
 0x292   : > { %v2320_v14 = vpop.f32.mrf.mxu3  ;;  %v2100_v32 = vadd.f32 %v2042_v38, %v1819_v33 }
 0x294   : > { %v2378_v63 = vadd.f32 %v2320_v14, %v2100_v32  ;;  %v2601_v41 = vpop.f32.mrf.mxu0 }
 0x296   : > { %v2656_v24 = vadd.f32 %v2598_v26, %v2378_v63  ;;  %v1782_v38 = vpop.f32.mrf.mxu1  ;;  %v1825_v63 = vadd.f32 %v1779_v50, %v4648_v13 }
 0x297   : > { %v1826_v48 = vadd.f32 %v1782_v38, %v4660_v27 }
 0x298   : > { %2691 = vrot.lane.b32.xlu1 %v2656_v24, %s3596_s5 }
 0x299   : > { %v2045_v18 = vpop.f32.mrf.mxu2 }
 0x29a   : > { %v2323_v45 = vpop.f32.mrf.mxu3  ;;  %v2101_v9 = vadd.f32 %v2045_v18, %v1820_v6 }
 0x29c   : > { %v2379_v39 = vadd.f32 %v2323_v45, %v2101_v9  ;;  %v2604_v47 = vpop.f32.mrf.mxu0 }
 0x29e   : > { %v2657_v15 = vadd.f32 %v2601_v41, %v2379_v39  ;;  %v1785_v18 = vpop.f32.mrf.mxu1 }
 0x2a0   : > { %2693 = vrot.lane.b32.xlu2 %v2657_v15, %s3596_s5 }
 0x2a1   : > { %v2048_v44 = vpop.f32.mrf.mxu2 }
 0x2a2   : > { %v2326_v57 = vpop.f32.mrf.mxu3  ;;  %v2102_v3 = vadd.f32 %v2048_v44, %v1821_v23 }
 0x2a4   : > { %v2380_v59 = vadd.f32 %v2326_v57, %v2102_v3  ;;  %v2607_v55 = vpop.f32.mrf.mxu0  ;;  %v1827_v3 = vadd.f32 %v1785_v18, %v4675_v43  ;;  %v5143_v43 = vld [vmem:[#allocation3_spill] sm:$0xff] }
 0x2a6   : > { %v2658_v17 = vadd.f32 %v2604_v47, %v2380_v59  ;;  %v1788_v57 = vpop.f32.mrf.mxu1 }
 0x2a7   : > { %v1828_v27 = vadd.f32 %v1788_v57, %v4688_v11  ;;  %v5144_v11 = vld [vmem:[#allocation7_spill] sm:$0xff] }
 0x2a8   : > { %2695 = vrot.lane.b32.xlu2 %v2658_v17, %s3596_s5 }
 0x2a9   : > { %v2051_v31 = vpop.f32.mrf.mxu2 }
 0x2aa   : > { %v2329_v61 = vpop.f32.mrf.mxu3  ;;  %v2103_v53 = vadd.f32 %v2051_v31, %v1822_v25 }
 0x2ac   : > { %v2381_v60 = vadd.f32 %v2329_v61, %v2103_v53  ;;  %v2610_v19 = vpop.f32.mrf.mxu0 }
 0x2ae   : > { %v2659_v52 = vadd.f32 %v2607_v55, %v2381_v60  ;;  %v1791_v61 = vpop.f32.mrf.mxu1 }
 0x2b0   : > { %2697 = vrot.lane.b32.xlu0 %v2659_v52, %s3596_s5 }
 0x2b1   : > { %v2054_v58 = vpop.f32.mrf.mxu2 }
 0x2b2   : > { %v2332_v20 = vpop.f32.mrf.mxu3  ;;  %v2104_v5 = vadd.f32 %v2054_v58, %v1823_v1  ;;  %v1829_v58 = vadd.f32 %v1791_v61, %v5143_v43 }
 0x2b4   : > { %v2382_v21 = vadd.f32 %v2332_v20, %v2104_v5  ;;  %v2613_v35 = vpop.f32.mrf.mxu0 }
 0x2b6   : > { %v2660_v26 = vadd.f32 %v2610_v19, %v2382_v21 }
 0x2b8   : > { %2699 = vrot.lane.b32.xlu1 %v2660_v26, %s3596_s5 }
 0x2b9   : > { %v2057_v2 = vpop.f32.mrf.mxu2 }
 0x2ba   : > { %v2335_v33 = vpop.f32.mrf.mxu3  ;;  %v2105_v14 = vadd.f32 %v2057_v2, %v1824_v8 }
 0x2bc   : > { %v2383_v7 = vadd.f32 %v2335_v33, %v2105_v14  ;;  %v2616_v32 = vpop.f32.mrf.mxu0 }
 0x2be   : > { %v2661_v22 = vadd.f32 %v2613_v35, %v2383_v7  ;;  %v1794_v35 = vpop.f32.mrf.mxu1 }
 0x2bf   : > { %v1830_v2 = vadd.f32 %v1794_v35, %v5144_v11 }
 0x2c0   : > { %2701 = vrot.lane.b32.xlu2 %v2661_v22, %s3596_s5 }
 0x2c1   : > { %v2060_v41 = vpop.f32.mrf.mxu2 }
 0x2c2   : > { %v2338_v24 = vpop.f32.mrf.mxu3  ;;  %v2106_v6 = vadd.f32 %v2060_v41, %v1825_v63 }
 0x2c4   : > { %v2384_v45 = vadd.f32 %v2338_v24, %v2106_v6  ;;  %v2619_v9 = vpop.f32.mrf.mxu0 }
 0x2c6   : > { %v2662_v12 = vadd.f32 %v2616_v32, %v2384_v45  ;;  %v1797_v22 = vpop.f32.mrf.mxu1 }
 0x2c7   : > { %v1831_v41 = vadd.f32 %v1797_v22, %v4733_v34 }
 0x2c8   : > { %2703 = vrot.lane.b32.xlu0 %v2662_v12, %s3596_s5 }
 0x2c9   : > { %v2063_v39 = vpop.f32.mrf.mxu2 }
 0x2ca   : > { %v2341_v47 = vpop.f32.mrf.mxu3  ;;  %v2107_v15 = vadd.f32 %v2063_v39, %v1826_v48 }
 0x2cc   : > { %v2385_v23 = vadd.f32 %v2341_v47, %v2107_v15  ;;  %v2622_v44 = vpop.f32.mrf.mxu0 }
 0x2ce   : > { %v2663_v13 = vadd.f32 %v2619_v9, %v2385_v23 }
 0x2d0   : > { %2705 = vrot.lane.b32.xlu1 %v2663_v13, %s3596_s5 }
 0x2d1   : > { %v2066_v59 = vpop.f32.mrf.mxu2 }
 0x2d2   : > { %v2344_v55 = vpop.f32.mrf.mxu3  ;;  %v2108_v28 = vadd.f32 %v2066_v59, %v1827_v3 }
 0x2d4   : > { %v2386_v17 = vadd.f32 %v2344_v55, %v2108_v28  ;;  %v2625_v25 = vpop.f32.mrf.mxu0 }
 0x2d6   : > { %v2664_v31 = vadd.f32 %v2622_v44, %v2386_v17 }
 0x2d8   : > { %2707 = vrot.lane.b32.xlu2 %v2664_v31, %s3596_s5 }
 0x2d9   : > { %v2069_v53 = vpop.f32.mrf.mxu2 }
 0x2da   : > { %v2347_v60 = vpop.f32.mrf.mxu3  ;;  %v2109_v19 = vadd.f32 %v2069_v53, %v1828_v27 }
 0x2dc   : > { %v2387_v52 = vadd.f32 %v2347_v60, %v2109_v19  ;;  %v2628_v50 = vpop.f32.mrf.mxu0 }
 0x2de   : > { %v2665_v1 = vadd.f32 %v2625_v25, %v2387_v52 }
 0x2e0   : > { %2709 = vrot.lane.b32.xlu0 %v2665_v1, %s3596_s5 }
 0x2e1   : > { %v2072_v20 = vpop.f32.mrf.mxu2 }
 0x2e2   : > { %v2350_v5 = vpop.f32.mrf.mxu3  ;;  %v2110_v21 = vadd.f32 %v2072_v20, %v1829_v58 }
 0x2e4   : > { %v2388_v26 = vadd.f32 %v2350_v5, %v2110_v21  ;;  %v2631_v33 = vpop.f32.mrf.mxu0 }
 0x2e6   : > { %v2666_v8 = vadd.f32 %v2628_v50, %v2388_v26 }
 0x2e8   : > { %2711 = vrot.lane.b32.xlu1 %v2666_v8, %s3596_s5 }
 0x2e9   : > { %v2075_v38 = vpop.f32.mrf.mxu2 }
 0x2ea   : > { %v2353_v14 = vpop.f32.mrf.mxu3  ;;  %v2111_v7 = vadd.f32 %v2075_v38, %v1830_v2 }
 0x2ec   : > { %v2389_v32 = vadd.f32 %v2353_v14, %v2111_v7  ;;  %v2634_v12 = vpop.f32.mrf.mxu0 }
 0x2ee   : > { %v2667_v63 = vadd.f32 %v2631_v33, %v2389_v32 }
 0x2f0   : > { %2713 = vrot.lane.b32.xlu2 %v2667_v63, %s3596_s5 }
 0x2f1   : > { %v2078_v24 = vpop.f32.mrf.mxu2 }
 0x2f2   : > { %v2356_v6 = vpop.f32.mrf.mxu3  ;;  %v2112_v18 = vadd.f32 %v2078_v24, %v1831_v41  ;;  %v2686_v45 = vpop.permute.xlu0 %2685 }
 0x2f3   : > { %v2734_v9 = vsel %vm2733_vm2, %v4743_v37, %v2686_v45 }
 0x2f4   : > { %v2390_v48 = vadd.f32 %v2356_v6, %v2112_v18  ;;  %3492 = vmatmul.msk.f32.vlgmr.msra.gmra.mxu1 %vm2756_vm3, %v2734_v9 }
 0x2f6   : > { %v2668_v39 = vadd.f32 %v2634_v12, %v2390_v48 }
 0x2f8   : > { %2715 = vrot.lane.b32.xlu0 %v2668_v39, %s3596_s5 }
 0x2fa   : > { %v2688_v47 = vpop.permute.xlu0 %2687  ;;  %v2694_v57 = vpop.permute.xlu2 %2693 }
 0x2fb   : > { %v2735_v34 = vsel %vm2733_vm2, %v4755_v40, %v2688_v47  ;;  %v2738_v13 = vsel %vm2733_vm2, %v4789_v10, %v2694_v57 }
 0x2fc   : > { %3493 = vmatmul.msk.f32.gmra.mxu1 %vm2756_vm3, %v2735_v34 }
 0x302   : > { %v2690_v15 = vpop.permute.xlu1 %2689  ;;  %v2696_v40 = vpop.permute.xlu2 %2695 }
 0x303   : > { %v2736_v23 = vsel %vm2733_vm2, %v4765_v29, %v2690_v15  ;;  %v2739_v3 = vsel %vm2733_vm2, %v4801_v49, %v2696_v40 }
 0x304   : > { %3494 = vmatmul.msk.f32.gmra.mxu1 %vm2756_vm3, %v2736_v23 }
 0x30a   : > { %v2692_v37 = vpop.permute.xlu1 %2691 }
 0x30b   : > { %v2737_v44 = vsel %vm2733_vm2, %v4777_v4, %v2692_v37 }
 0x30c   : > { %3495 = vmatmul.msk.f32.gmra.mxu1 %vm2756_vm3, %v2737_v44 }
 0x314   : > { %3496 = vmatmul.msk.f32.gmra.mxu1 %vm2756_vm3, %v2738_v13 }
 0x31a   : > { %v2702_v10 = vpop.permute.xlu2 %2701 }
 0x31b   : > { %v2742_v28 = vsel %vm2733_vm2, %v4833_v54, %v2702_v10 }
 0x31c   : > { %3497 = vmatmul.msk.f32.gmra.mxu1 %vm2756_vm3, %v2739_v3 }
 0x322   : > { %v2698_v29 = vpop.permute.xlu0 %2697 }
 0x323   : > { %v2740_v59 = vsel %vm2733_vm2, %v4813_v36, %v2698_v29 }
 0x324   : > { %3498 = vmatmul.msk.f32.gmra.mxu1 %vm2756_vm3, %v2740_v59 }
 0x32a   : > { %v2700_v4 = vpop.permute.xlu1 %2699 }
 0x32b   : > { %v2741_v55 = vsel %vm2733_vm2, %v4823_v42, %v2700_v4 }
 0x32c   : > { %3499 = vmatmul.msk.f32.gmra.mxu1 %vm2756_vm3, %v2741_v55 }
 0x332   : > { %v2708_v42 = vpop.permute.xlu2 %2707 }
 0x333   : > { %v2745_v54 = vsel %vm2733_vm2, %v4864_v46, %v2708_v42 }
 0x334   : > { %3500 = vmatmul.msk.f32.gmra.mxu1 %vm2756_vm3, %v2742_v28 }
 0x33a   : > { %v2704_v49 = vpop.permute.xlu0 %2703 }
 0x33b   : > { %v2743_v17 = vsel %vm2733_vm2, %v4843_v56, %v2704_v49 }
 0x33c   : > { %3501 = vmatmul.msk.f32.gmra.mxu1 %vm2756_vm3, %v2743_v17 }
 0x342   : > { %v2706_v36 = vpop.permute.xlu1 %2705 }
 0x343   : > { %v2744_v25 = vsel %vm2733_vm2, %v4853_v30, %v2706_v36 }
 0x344   : > { %3502 = vmatmul.msk.f32.gmra.mxu1 %vm2756_vm3, %v2744_v25 }
 0x34a   : > { %v2714_v30 = vpop.permute.xlu2 %2713 }
 0x34b   : > { %v2748_v53 = vsel %vm2733_vm2, %v4895_v51, %v2714_v30 }
 0x34c   : > { %3503 = vmatmul.msk.f32.gmra.mxu1 %vm2756_vm3, %v2745_v54 }
 0x352   : > { %v2710_v31 = vpop.permute.xlu0 %2709 }
 0x353   : > { %v2746_v27 = vsel %vm2733_vm2, %v4874_v62, %v2710_v31 }
 0x354   : > { %3504 = vmatmul.msk.f32.gmra.mxu1 %vm2756_vm3, %v2746_v27 }
 0x35a   : > { %v2712_v56 = vpop.permute.xlu1 %2711 }
 0x35b   : > { %v2747_v61 = vsel %vm2733_vm2, %v4886_v16, %v2712_v56  ;;  %v3555_v16 = vld [vmem:[%s5043_s3] ss:$0 sm:$0xff] }
 0x35c   : > { %3505 = vmatmul.msk.f32.gmra.mxu1 %vm2756_vm3, %v2747_v61 }
 0x364   : > { %3506 = vmatmul.msk.f32.gmra.mxu1 %vm2756_vm3, %v2748_v53 }
 0x36a   : > { %v2716_v46 = vpop.permute.xlu0 %2715 }
 0x36b   : > { %v2749_v62 = vsel %vm2733_vm2, %v4901_v0, %v2716_v46 }
 0x36c   : > { %3507 = vmatmul.msk.f32.gmra.mxu1 %vm2756_vm3, %v2749_v62 }
 0x371   : > { %v2822_v51 = vpop.f32.mrf.mxu1 }
 0x372   : > { %v2823_v0 = vadd.f32 %v3555_v16, %v2822_v51 }
 0x374   : > { %2870 = vst.msk [vmem:[%s4991_s13] sm:$0xff] %vm2756_vm3, %v2823_v0 }
 0x379   : > { %v2825_v60 = vpop.f32.mrf.mxu1 }
 0x37a   : > { %v2826_v19 = vadd.f32 %v3555_v16, %v2825_v60 }
 0x37c   : > { %2871 = vst.msk [vmem:[%s4991_s13 + $0x8] sm:$0xff] %vm2756_vm3, %v2826_v19 }
 0x381   : > { %v2828_v52 = vpop.f32.mrf.mxu1 }
 0x382   : > { %v2829_v1 = vadd.f32 %v3555_v16, %v2828_v52 }
 0x384   : > { %2872 = vst.msk [vmem:[%s4991_s13 + $0x10] sm:$0xff] %vm2756_vm3, %v2829_v1 }
 0x389   : > { %v2831_v50 = vpop.f32.mrf.mxu1 }
 0x38a   : > { %v2832_v43 = vadd.f32 %v3555_v16, %v2831_v50 }
 0x38c   : > { %2873 = vst.msk [vmem:[%s4991_s13 + $0x18] sm:$0xff] %vm2756_vm3, %v2832_v43 }
 0x391   : > { %v2834_v58 = vpop.f32.mrf.mxu1 }
 0x392   : > { %v2835_v20 = vadd.f32 %v3555_v16, %v2834_v58 }
 0x394   : > { %2874 = vst.msk [vmem:[%s4991_s13 + $0x20] sm:$0xff] %vm2756_vm3, %v2835_v20 }
 0x399   : > { %v2837_v5 = vpop.f32.mrf.mxu1 }
 0x39a   : > { %v2838_v21 = vadd.f32 %v3555_v16, %v2837_v5 }
 0x39c   : > { %2875 = vst.msk [vmem:[%s4991_s13 + $0x28] sm:$0xff] %vm2756_vm3, %v2838_v21 }
 0x3a1   : > { %v2840_v35 = vpop.f32.mrf.mxu1 }
 0x3a2   : > { %v2841_v26 = vadd.f32 %v3555_v16, %v2840_v35 }
 0x3a4   : > { %2876 = vst.msk [vmem:[%s4991_s13 + $0x30] sm:$0xff] %vm2756_vm3, %v2841_v26 }
 0x3a9   : > { %v2843_v8 = vpop.f32.mrf.mxu1 }
 0x3aa   : > { %v2844_v11 = vadd.f32 %v3555_v16, %v2843_v8 }
 0x3ac   : > { %2877 = vst.msk [vmem:[%s4991_s13 + $0x38] sm:$0xff] %vm2756_vm3, %v2844_v11 }
 0x3b1   : > { %v2846_v2 = vpop.f32.mrf.mxu1 }
 0x3b2   : > { %v2847_v33 = vadd.f32 %v3555_v16, %v2846_v2 }
 0x3b4   : > { %2878 = vst.msk [vmem:[%s4991_s13 + $0x40] sm:$0xff] %vm2756_vm3, %v2847_v33 }
 0x3b9   : > { %v2849_v38 = vpop.f32.mrf.mxu1 }
 0x3ba   : > { %v2850_v14 = vadd.f32 %v3555_v16, %v2849_v38 }
 0x3bc   : > { %2879 = vst.msk [vmem:[%s4991_s13 + $0x48] sm:$0xff] %vm2756_vm3, %v2850_v14 }
 0x3c1   : > { %v2852_v7 = vpop.f32.mrf.mxu1 }
 0x3c2   : > { %v2853_v32 = vadd.f32 %v3555_v16, %v2852_v7 }
 0x3c4   : > { %2880 = vst.msk [vmem:[%s4991_s13 + $0x50] sm:$0xff] %vm2756_vm3, %v2853_v32 }
 0x3c9   : > { %v2855_v22 = vpop.f32.mrf.mxu1 }
 0x3ca   : > { %v2856_v63 = vadd.f32 %v3555_v16, %v2855_v22 }
 0x3cc   : > { %2881 = vst.msk [vmem:[%s4991_s13 + $0x58] sm:$0xff] %vm2756_vm3, %v2856_v63 }
 0x3d1   : > { %v2858_v41 = vpop.f32.mrf.mxu1 }
 0x3d2   : > { %v2859_v24 = vadd.f32 %v3555_v16, %v2858_v41 }
 0x3d4   : > { %2882 = vst.msk [vmem:[%s4991_s13 + $0x60] sm:$0xff] %vm2756_vm3, %v2859_v24 }
 0x3d9   : > { %v2861_v6 = vpop.f32.mrf.mxu1 }
 0x3da   : > { %v2862_v18 = vadd.f32 %v3555_v16, %v2861_v6 }
 0x3dc   : > { %2883 = vst.msk [vmem:[%s4991_s13 + $0x68] sm:$0xff] %vm2756_vm3, %v2862_v18 }
 0x3e1   : > { %v2864_v45 = vpop.f32.mrf.mxu1 }
 0x3e2   : > { %v2865_v9 = vadd.f32 %v3555_v16, %v2864_v45 }
 0x3e4   : > { %2884 = vst.msk [vmem:[%s4991_s13 + $0x70] sm:$0xff] %vm2756_vm3, %v2865_v9 }
 0x3e9   : > { %v2867_v12 = vpop.f32.mrf.mxu1 }
 0x3ea   : > { %v2868_v48 = vadd.f32 %v3555_v16, %v2867_v12 }
 0x3ec   : > { %2885 = vst.msk [vmem:[%s4991_s13 + $0x78] sm:$0xff] %vm2756_vm3, %v2868_v48 }
 0x3ed PF: > { %s14_s19 = sadd.s32 1, %s3594_s19   ;;  %s5145_s15 = smov %s3586_s17 }
 0x3ee   : > { %p11_p7 = scmp.ge.s32.totalorder %s14_s19, 6   ;;  %s5146_s16 = smov %s3590_s18 }
 0x3ef   : > { %s5147_s17 = smov %s5150_s20  ;;  %s5148_s18 = smov %s5154_s21 }
 0x3f0   :  { %13 = sbr.rel (!%p11_p7) target bundleno = 3 (0x3), region = 77 }

</bundles_post_ra>
